<compile_context>
chip_gen: v7x
topology: tpu7x:2x2x1
jax: 0.10.0
libtpu: 0.0.40
codegen_flags: <defaults>
</compile_context>

<pallas_src>
import functools

import jax
import jax.numpy as jnp
import numpy as np
from jax.experimental import pallas as pl
from jax.experimental.pallas import tpu as pltpu


# ----------------------------------------------------------------------------
# Fused Pallas kernel: LSTM1 + LSTM2 + LSTM3 + (relu(fc) -> out) head.
# Combined gate order along the 4H lane axis: [i | f | g | o] (PyTorch order).
# ----------------------------------------------------------------------------
def _fused_atten_clstm_kernel(
    x1_ref, x2_ref, hc0_ref, w_ref, b_ref, out_ref,
    *, B, T1, T2, H, In1, In2, offs,
):
    f32 = jnp.float32
    L = w_ref.shape[1]                       # = 4H (combined-gate lane width)

    def dot(a, b):
        return jnp.dot(a, b, preferred_element_type=f32)

    # --- unpack the lane-dense weight slab (static, 8-aligned row slices) ----
    w_ih1 = w_ref[offs["ih1"]:offs["ih1"] + In1, :]
    w_ih2 = w_ref[offs["ih2"]:offs["ih2"] + In2, :]
    w_ih3 = w_ref[offs["ih3"]:offs["ih3"] + 2 * H, :]
    w_hh1 = w_ref[offs["hh1"]:offs["hh1"] + H, :]
    w_hh2 = w_ref[offs["hh2"]:offs["hh2"] + H, :]
    w_hh3 = w_ref[offs["hh3"]:offs["hh3"] + H, :]
    w_fc = w_ref[offs["fc"]:offs["fc"] + H, :]       # cols >= FC are zero
    w_out = w_ref[offs["out"]:offs["out"] + L, :]    # rows >= FC / cols >= OUT zero

    b1, b2, b3 = b_ref[0:1, :], b_ref[1:2, :], b_ref[2:3, :]
    b_fc, b_out = b_ref[3:4, :], b_ref[4:5, :]

    def recurrence(xp, w_hh, h, c, n_steps, keep_from=0):
        """xp: hoisted [T*B, 4H] input projection (+bias).

        Fully unrolled (n_steps static); ONE [B,H]@[H,4H] matmul per step,
        then static lane slices split the four gates.  h/c are vreg carries.
        Hidden outputs before `keep_from` are not retained (dead for LSTM2).
        """
        hs = []
        for t in range(n_steps):
            g = xp[t * B:(t + 1) * B, :] + dot(h, w_hh)        # [B, 4H]
            i_g = jax.nn.sigmoid(g[:, 0 * H:1 * H])
            f_g = jax.nn.sigmoid(g[:, 1 * H:2 * H])
            g_g = jnp.tanh(g[:, 2 * H:3 * H])
            o_g = jax.nn.sigmoid(g[:, 3 * H:4 * H])
            c = f_g * c + i_g * g_g
            h = o_g * jnp.tanh(c)
            if t >= keep_from:
                hs.append(h)
        return hs, h, c

    # ---- LSTM1: hoisted single-matmul input projection, then recurrence ----
    xp1 = dot(x1_ref[...], w_ih1) + b1                         # [T1*B, 4H]
    hs1, h1T, c1T = recurrence(xp1, w_hh1, hc0_ref[0], hc0_ref[1], T1)

    # ---- LSTM2: keep only the last T1 hidden outputs --------------------
    xp2 = dot(x2_ref[...], w_ih2) + b2                         # [T2*B, 4H]
    hs2, h2T, c2T = recurrence(xp2, w_hh2, hc0_ref[2], hc0_ref[3], T2,
                               keep_from=T2 - T1)

    # ---- LSTM3: single fused projection of the lane-concatenated merge ----
    out1_tm = jnp.concatenate(hs1, axis=0)                     # [T1*B, H] time-major
    out2_tm = jnp.concatenate(hs2, axis=0)                     # [T1*B, H]
    merge = jnp.concatenate([out1_tm, out2_tm], axis=-1)       # [T1*B, 2H]
    xp3 = dot(merge, w_ih3) + b3                               # [T1*B, 4H]
    hs3, h3T, c3T = recurrence(xp3, w_hh3, hc0_ref[4], hc0_ref[5], T1)

    # ---- head, rows re-ordered batch-major (row = b*T1 + t) so the wrapper
    #      only slices/reshapes (no transpose) -------------------------------
    out3_bm = jnp.concatenate(
        [hs3[t][b:b + 1, :] for b in range(B) for t in range(T1)], axis=0)
    hid = jnp.maximum(dot(out3_bm, w_fc) + b_fc, 0.0)          # [T1*B, L]
    head = dot(hid, w_out) + b_out                             # [T1*B, L], lanes 0:OUT real

    # ---- one lane-dense output slab ----------------------------------------
    out_ref[0:T1 * B, :] = head
    out_ref[T1 * B:T1 * B + B, :] = jnp.concatenate(
        [h1T, c1T, h2T, c2T], axis=-1)                         # [B, 4H]
    out_ref[T1 * B + B:T1 * B + 2 * B, :] = jnp.concatenate(
        [h3T, c3T, jnp.zeros((B, L - 2 * H), f32)], axis=-1)   # [B, 4H]


# ----------------------------------------------------------------------------
# One-time operand packing (NOT on the per-call hot path).
# ----------------------------------------------------------------------------
def pack_params(params):
    w_ih1, w_hh1, b1 = params["lstm1"]
    w_ih2, w_hh2, b2 = params["lstm2"]
    w_ih3, w_hh3, b3 = params["lstm3"]
    In1, L = w_ih1.shape
    In2 = w_ih2.shape[0]
    H = L // 4
    FC = params["fc_w"].shape[-1]
    OUT = params["out_w"].shape[-1]
    assert H % 8 == 0 and FC <= L and OUT <= L

    def rup8(n):
        return -(-n // 8) * 8

    def padrows(w, rows):
        return jnp.pad(w, ((0, rows - w.shape[0]), (0, 0)))

    def padcols(w, cols):
        return jnp.pad(w, ((0, 0), (0, cols - w.shape[1])))

    sections = [
        ("ih1", padrows(w_ih1, rup8(In1))),
        ("ih2", padrows(w_ih2, rup8(In2))),
        ("ih3", padrows(w_ih3, rup8(2 * H))),
        ("hh1", w_hh1),
        ("hh2", w_hh2),
        ("hh3", w_hh3),
        ("fc", padcols(params["fc_w"], L)),              # [H, L]
        ("out", padrows(padcols(params["out_w"], L), L)),  # [L, L]
    ]
    offs, parts, row = {}, [], 0
    for name, mat in sections:
        offs[name] = row
        row += mat.shape[0]
        parts.append(mat)
    wslab = jnp.concatenate(parts, axis=0)               # [rows, 4H], lane-dense

    bslab = jnp.zeros((8, L), jnp.float32)
    bslab = bslab.at[0, :].set(b1.reshape(L))
    bslab = bslab.at[1, :].set(b2.reshape(L))
    bslab = bslab.at[2, :].set(b3.reshape(L))
    bslab = bslab.at[3, :FC].set(params["fc_b"].reshape(FC))
    bslab = bslab.at[4, :OUT].set(params["out_b"].reshape(OUT))

    meta = {"H": H, "In1": In1, "In2": In2, "FC": FC, "OUT": OUT, "L": L,
            "offs": offs}
    return wslab, bslab, meta


# ----------------------------------------------------------------------------
# Full module forward (wrapper: layout plumbing only; all compute in Pallas).
# ----------------------------------------------------------------------------
def atten_clstm_forward(wslab, bslab, x, hidden1, hidden2, merge_hidden,
                        *, meta, timestep):
    x1, x2 = x
    n_sample = x1.shape[0]
    hidden1 = tuple(h[:, -n_sample:, :] for h in hidden1)
    hidden2 = tuple(h[:, -n_sample:, :] for h in hidden2)
    merge_hidden = tuple(h[:, -n_sample:, :] for h in merge_hidden)

    B, T1, In1 = x1.shape
    T2, In2 = x2.shape[1], x2.shape[2]
    H, L, OUT = meta["H"], meta["L"], meta["OUT"]
    assert In1 == meta["In1"] and In2 == meta["In2"]
    assert H == merge_hidden[0].shape[-1]
    # TODO(synk): the PyTorch timestep==1 branch produces a 4-D tensor that
    # cannot be concatenated with lstm_out1 (upstream bug); only
    # timestep == x1-seq-len is modeled.
    assert timestep == T1 and T2 >= T1

    # Time-major, (time*batch)-flattened inputs (row = t*B + b).  These two
    # tiny transposes fuse into one copy fusion; the output path is batch-major
    # inside the kernel so nothing is transposed on the way out.
    x1_flat = jnp.transpose(x1, (1, 0, 2)).reshape(T1 * B, In1)
    x2_flat = jnp.transpose(x2, (1, 0, 2)).reshape(T2 * B, In2)
    hc0 = jnp.stack([hidden1[0][0], hidden1[1][0],
                     hidden2[0][0], hidden2[1][0],
                     merge_hidden[0][0], merge_hidden[1][0]])     # [6, B, H]

    out_rows = T1 * B + 2 * B

    mm = lambda m, k, n: 2 * m * k * n
    flops = (mm(T1 * B, In1, L) + mm(T2 * B, In2, L) + mm(T1 * B, 2 * H, L)
             + (2 * T1 + T2) * mm(B, H, L)
             + mm(T1 * B, H, L) + mm(T1 * B, L, L))
    transcendentals = (2 * T1 + T2) * 5 * B * H
    bytes_accessed = 4 * (T1 * B * In1 + T2 * B * In2 + 6 * B * H
                          + int(wslab.size) + int(bslab.size) + out_rows * L)

    kernel = functools.partial(
        _fused_atten_clstm_kernel,
        B=B, T1=T1, T2=T2, H=H, In1=In1, In2=In2, offs=meta["offs"])

    vmem_spec = pl.BlockSpec(memory_space=pltpu.MemorySpace.VMEM)
    slab = pl.pallas_call(
        kernel,
        out_shape=jax.ShapeDtypeStruct((out_rows, L), jnp.float32),
        in_specs=[vmem_spec] * 5,
        out_specs=vmem_spec,
        cost_estimate=pl.CostEstimate(flops=flops,
                                      transcendentals=transcendentals,
                                      bytes_accessed=bytes_accessed),
    )(x1_flat, x2_flat, hc0, wslab, bslab)

    output = slab[:T1 * B, :OUT].reshape(B, T1, OUT)     # rows already b*T1 + t
    st_a = slab[T1 * B:T1 * B + B, :]                    # [h1 | c1 | h2 | c2]
    st_b = slab[T1 * B + B:, :]                          # [h3 | c3 | 0]
    h1, c1 = st_a[None, :, 0:H], st_a[None, :, H:2 * H]
    h2, c2 = st_a[None, :, 2 * H:3 * H], st_a[None, :, 3 * H:4 * H]
    h3, c3 = st_b[None, :, 0:H], st_b[None, :, H:2 * H]
    return output, (h1, c1), (h2, c2), (h3, c3)


# ----------------------------------------------------------------------------
# Pure-JAX reference for verification (combined [In,4H]/[H,4H]/[1,4H] layout).
# ----------------------------------------------------------------------------
def _lstm_ref(x_bti, h0, c0, w_ih, w_hh, b):
    H = h0.shape[-1]

    def step(carry, x_t):
        h, c = carry
        gates = x_t @ w_ih + h @ w_hh + b
        i_g = jax.nn.sigmoid(gates[:, :H])
        f_g = jax.nn.sigmoid(gates[:, H:2 * H])
        g_g = jnp.tanh(gates[:, 2 * H:3 * H])
        o_g = jax.nn.sigmoid(gates[:, 3 * H:])
        c = f_g * c + i_g * g_g
        h = o_g * jnp.tanh(c)
        return (h, c), h

    (hT, cT), hs = jax.lax.scan(step, (h0, c0), jnp.transpose(x_bti, (1, 0, 2)))
    return jnp.transpose(hs, (1, 0, 2)), hT, cT


def _ref_forward(params, x, hidden1, hidden2, merge_hidden, timestep):
    x1, x2 = x
    out1, h1, c1 = _lstm_ref(x1, hidden1[0][0], hidden1[1][0], *params["lstm1"])
    out2, h2, c2 = _lstm_ref(x2, hidden2[0][0], hidden2[1][0], *params["lstm2"])
    out2 = out2[:, -timestep:, :]
    merge = jnp.concatenate([out1, out2], axis=-1)
    out3, h3, c3 = _lstm_ref(merge, merge_hidden[0][0], merge_hidden[1][0],
                             *params["lstm3"])
    B, T, H = out3.shape
    hid = jnp.maximum(out3.reshape(B * T, H) @ params["fc_w"] + params["fc_b"], 0.0)
    out = (hid @ params["out_w"] + params["out_b"]).reshape(B, T, -1)
    return out, (h1, c1), (h2, c2), (h3, c3)


# ----------------------------------------------------------------------------
# Deterministic parameter init (uniform(-1/sqrt(H), 1/sqrt(H)), PyTorch-like).
# Note: the combined bias is sampled once whereas PyTorch sums two independent
# draws (b_ih + b_hh) — an init-distribution difference only, not forward math.
# ----------------------------------------------------------------------------
def make_params(key, input_size1, input_size2, hidden_size, fc_units, output_size):
    H = hidden_size
    k = 1.0 / np.sqrt(H)
    keys = iter(jax.random.split(key, 16))

    def u(shape):
        return jax.random.uniform(next(keys), shape, jnp.float32, -k, k)

    def lstm_params(in_size):
        # combined-gate layout: W_ih [In, 4H], W_hh [H, 4H], bias [1, 4H]
        return (u((in_size, 4 * H)), u((H, 4 * H)), u((1, 4 * H)))

    return {
        "lstm1": lstm_params(input_size1),
        "lstm2": lstm_params(input_size2),
        "lstm3": lstm_params(2 * H),
        "fc_w": u((H, fc_units)), "fc_b": u((1, fc_units)),
        "out_w": u((fc_units, output_size)), "out_b": u((1, output_size)),
    }


if __name__ == "__main__":
    # Small shapes consistent with the module.
    B = 2            # batch_size
    H = 32           # hidden_size
    IN1, IN2 = 8, 8  # input_size1, input_size2
    TIMESTEP = 4     # timestep (and seq len of x1)
    T2 = 8           # seq len of x2 (last TIMESTEP steps used)
    FC = 16          # fc_units
    OUT = 1          # output_size
    NL = 1           # num_lstm_layers

    root = jax.random.PRNGKey(0)
    kp, k1, k2, kh = jax.random.split(root, 4)
    params = make_params(kp, IN1, IN2, H, FC, OUT)

    x1 = jax.random.normal(k1, (B, TIMESTEP, IN1), jnp.float32)
    x2 = jax.random.normal(k2, (B, T2, IN2), jnp.float32)
    hk = jax.random.split(kh, 6)
    hidden1 = (jax.random.normal(hk[0], (NL, B, H), jnp.float32),
               jax.random.normal(hk[1], (NL, B, H), jnp.float32))
    hidden2 = (jax.random.normal(hk[2], (NL, B, H), jnp.float32),
               jax.random.normal(hk[3], (NL, B, H), jnp.float32))
    merge_hidden = (jax.random.normal(hk[4], (NL, B, H), jnp.float32),
                    jax.random.normal(hk[5], (NL, B, H), jnp.float32))

    # One-time weight packing (off the hot path), then the jitted fused forward.
    wslab, bslab, meta = pack_params(params)
    fwd = jax.jit(functools.partial(atten_clstm_forward, meta=meta,
                                    timestep=TIMESTEP))
    output, h1_out, h2_out, hm_out = fwd(wslab, bslab, (x1, x2),
                                         hidden1, hidden2, merge_hidden)
    jax.block_until_ready((output, h1_out, h2_out, hm_out))

    # Verify against pure-JAX reference (output + all final hidden states).
    ref_out, ref_s1, ref_s2, ref_s3 = _ref_forward(
        params, (x1, x2), hidden1, hidden2, merge_hidden, TIMESTEP)
    np.testing.assert_allclose(np.asarray(output), np.asarray(ref_out),
                               rtol=1e-5, atol=1e-5)
    for got, want in [(h1_out[0][0], ref_s1[0]), (h1_out[1][0], ref_s1[1]),
                      (h2_out[0][0], ref_s2[0]), (h2_out[1][0], ref_s2[1]),
                      (hm_out[0][0], ref_s3[0]), (hm_out[1][0], ref_s3[1])]:
        np.testing.assert_allclose(np.asarray(got), np.asarray(want),
                                   rtol=1e-5, atol=1e-5)
    assert output.shape == (B, TIMESTEP, OUT)
    assert h1_out[0].shape == (NL, B, H) and hm_out[1].shape == (NL, B, H)

    print("KERNEL_OK")
</pallas_src>

<mosaic_0001>
module attributes {stable_mosaic.version = 11 : i64} {
  func.func @_fused_atten_clstm_kernel(%arg0: memref<8x8xf32, #tpu.memory_space<vmem>>, %arg1: memref<16x8xf32, #tpu.memory_space<vmem>>, %arg2: memref<6x2x32xf32, #tpu.memory_space<vmem>>, %arg3: memref<336x128xf32, #tpu.memory_space<vmem>>, %arg4: memref<8x128xf32, #tpu.memory_space<vmem>>, %arg5: memref<12x128xf32, #tpu.memory_space<vmem>>) attributes {dimension_semantics = [], scalar_prefetch = 0 : i64, scratch_operands = 0 : i64, tpu.core_type = #tpu.core_type<tc>} {
    %c0 = arith.constant 0 : index
    %c0_0 = arith.constant 0 : index
    %0 = vector.load %arg3[%c0, %c0_0] : memref<336x128xf32, #tpu.memory_space<vmem>>, vector<8x128xf32>
    %c8 = arith.constant 8 : index
    %c0_1 = arith.constant 0 : index
    %1 = vector.load %arg3[%c8, %c0_1] : memref<336x128xf32, #tpu.memory_space<vmem>>, vector<8x128xf32>
    %c16 = arith.constant 16 : index
    %c0_2 = arith.constant 0 : index
    %2 = vector.load %arg3[%c16, %c0_2] : memref<336x128xf32, #tpu.memory_space<vmem>>, vector<64x128xf32>
    %c80 = arith.constant 80 : index
    %c0_3 = arith.constant 0 : index
    %3 = vector.load %arg3[%c80, %c0_3] : memref<336x128xf32, #tpu.memory_space<vmem>>, vector<32x128xf32>
    %c112 = arith.constant 112 : index
    %c0_4 = arith.constant 0 : index
    %4 = vector.load %arg3[%c112, %c0_4] : memref<336x128xf32, #tpu.memory_space<vmem>>, vector<32x128xf32>
    %c144 = arith.constant 144 : index
    %c0_5 = arith.constant 0 : index
    %5 = vector.load %arg3[%c144, %c0_5] : memref<336x128xf32, #tpu.memory_space<vmem>>, vector<32x128xf32>
    %c176 = arith.constant 176 : index
    %c0_6 = arith.constant 0 : index
    %6 = vector.load %arg3[%c176, %c0_6] : memref<336x128xf32, #tpu.memory_space<vmem>>, vector<32x128xf32>
    %c208 = arith.constant 208 : index
    %c0_7 = arith.constant 0 : index
    %7 = vector.load %arg3[%c208, %c0_7] : memref<336x128xf32, #tpu.memory_space<vmem>>, vector<128x128xf32>
    %c0_8 = arith.constant 0 : index
    %c0_9 = arith.constant 0 : index
    %8 = vector.load %arg4[%c0_8, %c0_9] : memref<8x128xf32, #tpu.memory_space<vmem>>, vector<1x128xf32>
    %c1 = arith.constant 1 : index
    %c0_10 = arith.constant 0 : index
    %9 = vector.load %arg4[%c1, %c0_10] : memref<8x128xf32, #tpu.memory_space<vmem>>, vector<1x128xf32>
    %c2 = arith.constant 2 : index
    %c0_11 = arith.constant 0 : index
    %10 = vector.load %arg4[%c2, %c0_11] : memref<8x128xf32, #tpu.memory_space<vmem>>, vector<1x128xf32>
    %c3 = arith.constant 3 : index
    %c0_12 = arith.constant 0 : index
    %11 = vector.load %arg4[%c3, %c0_12] : memref<8x128xf32, #tpu.memory_space<vmem>>, vector<1x128xf32>
    %c4 = arith.constant 4 : index
    %c0_13 = arith.constant 0 : index
    %12 = vector.load %arg4[%c4, %c0_13] : memref<8x128xf32, #tpu.memory_space<vmem>>, vector<1x128xf32>
    %c0_14 = arith.constant 0 : index
    %c0_15 = arith.constant 0 : index
    %13 = vector.load %arg0[%c0_14, %c0_15] : memref<8x8xf32, #tpu.memory_space<vmem>>, vector<8x8xf32>
    %cst = arith.constant dense<0.000000e+00> : vector<8x128xf32>
    %14 = tpu.matmul %13, %0, %cst {dimension_numbers = #tpu.dot_dimension_numbers<[1], [0], [0], [1], [0, 0, 1, 1], [], []>} : vector<8x8xf32>, vector<8x128xf32>, vector<8x128xf32> -> vector<8x128xf32>
    %15 = vector.broadcast %8 : vector<1x128xf32> to vector<8x128xf32>
    %16 = arith.addf %14, %15 : vector<8x128xf32>
    %c0_16 = arith.constant 0 : index
    %c0_17 = arith.constant 0 : index
    %c0_18 = arith.constant 0 : index
    %17 = vector.load %arg2[%c0_16, %c0_17, %c0_18] : memref<6x2x32xf32, #tpu.memory_space<vmem>>, vector<1x2x32xf32>
    %18 = vector.shape_cast %17 : vector<1x2x32xf32> to vector<2x32xf32>
    %c1_19 = arith.constant 1 : index
    %c0_20 = arith.constant 0 : index
    %c0_21 = arith.constant 0 : index
    %19 = vector.load %arg2[%c1_19, %c0_20, %c0_21] : memref<6x2x32xf32, #tpu.memory_space<vmem>>, vector<1x2x32xf32>
    %20 = vector.shape_cast %19 : vector<1x2x32xf32> to vector<2x32xf32>
    %21 = vector.extract_strided_slice %16 {offsets = [0, 0], sizes = [2, 128], strides = [1, 1]} : vector<8x128xf32> to vector<2x128xf32>
    %cst_22 = arith.constant dense<0.000000e+00> : vector<2x128xf32>
    %22 = tpu.matmul %18, %3, %cst_22 {dimension_numbers = #tpu.dot_dimension_numbers<[1], [0], [0], [1], [0, 0, 1, 1], [], []>} : vector<2x32xf32>, vector<32x128xf32>, vector<2x128xf32> -> vector<2x128xf32>
    %23 = arith.addf %21, %22 : vector<2x128xf32>
    %24 = vector.extract_strided_slice %23 {offsets = [0, 0], sizes = [2, 32], strides = [1, 1]} : vector<2x128xf32> to vector<2x32xf32>
    %25 = arith.negf %24 : vector<2x32xf32>
    %26 = math.exp %25 : vector<2x32xf32>
    %cst_23 = arith.constant 1.000000e+00 : f32
    %27 = vector.broadcast %cst_23 : f32 to vector<2x32xf32>
    %28 = arith.addf %27, %26 : vector<2x32xf32>
    %29 = arith.divf %27, %28 : vector<2x32xf32>
    %30 = vector.extract_strided_slice %23 {offsets = [0, 32], sizes = [2, 32], strides = [1, 1]} : vector<2x128xf32> to vector<2x32xf32>
    %31 = arith.negf %30 : vector<2x32xf32>
    %32 = math.exp %31 : vector<2x32xf32>
    %cst_24 = arith.constant 1.000000e+00 : f32
    %33 = vector.broadcast %cst_24 : f32 to vector<2x32xf32>
    %34 = arith.addf %33, %32 : vector<2x32xf32>
    %35 = arith.divf %33, %34 : vector<2x32xf32>
    %36 = vector.extract_strided_slice %23 {offsets = [0, 64], sizes = [2, 32], strides = [1, 1]} : vector<2x128xf32> to vector<2x32xf32>
    %37 = math.tanh %36 : vector<2x32xf32>
    %38 = vector.extract_strided_slice %23 {offsets = [0, 96], sizes = [2, 32], strides = [1, 1]} : vector<2x128xf32> to vector<2x32xf32>
    %39 = arith.negf %38 : vector<2x32xf32>
    %40 = math.exp %39 : vector<2x32xf32>
    %cst_25 = arith.constant 1.000000e+00 : f32
    %41 = vector.broadcast %cst_25 : f32 to vector<2x32xf32>
    %42 = arith.addf %41, %40 : vector<2x32xf32>
    %43 = arith.divf %41, %42 : vector<2x32xf32>
    %44 = arith.mulf %35, %20 : vector<2x32xf32>
    %45 = arith.mulf %29, %37 : vector<2x32xf32>
    %46 = arith.addf %44, %45 : vector<2x32xf32>
    %47 = math.tanh %46 : vector<2x32xf32>
    %48 = arith.mulf %43, %47 : vector<2x32xf32>
    %49 = vector.extract_strided_slice %16 {offsets = [2, 0], sizes = [2, 128], strides = [1, 1]} : vector<8x128xf32> to vector<2x128xf32>
    %cst_26 = arith.constant dense<0.000000e+00> : vector<2x128xf32>
    %50 = tpu.matmul %48, %3, %cst_26 {dimension_numbers = #tpu.dot_dimension_numbers<[1], [0], [0], [1], [0, 0, 1, 1], [], []>} : vector<2x32xf32>, vector<32x128xf32>, vector<2x128xf32> -> vector<2x128xf32>
    %51 = arith.addf %49, %50 : vector<2x128xf32>
    %52 = vector.extract_strided_slice %51 {offsets = [0, 0], sizes = [2, 32], strides = [1, 1]} : vector<2x128xf32> to vector<2x32xf32>
    %53 = arith.negf %52 : vector<2x32xf32>
    %54 = math.exp %53 : vector<2x32xf32>
    %cst_27 = arith.constant 1.000000e+00 : f32
    %55 = vector.broadcast %cst_27 : f32 to vector<2x32xf32>
    %56 = arith.addf %55, %54 : vector<2x32xf32>
    %57 = arith.divf %55, %56 : vector<2x32xf32>
    %58 = vector.extract_strided_slice %51 {offsets = [0, 32], sizes = [2, 32], strides = [1, 1]} : vector<2x128xf32> to vector<2x32xf32>
    %59 = arith.negf %58 : vector<2x32xf32>
    %60 = math.exp %59 : vector<2x32xf32>
    %cst_28 = arith.constant 1.000000e+00 : f32
    %61 = vector.broadcast %cst_28 : f32 to vector<2x32xf32>
    %62 = arith.addf %61, %60 : vector<2x32xf32>
    %63 = arith.divf %61, %62 : vector<2x32xf32>
    %64 = vector.extract_strided_slice %51 {offsets = [0, 64], sizes = [2, 32], strides = [1, 1]} : vector<2x128xf32> to vector<2x32xf32>
    %65 = math.tanh %64 : vector<2x32xf32>
    %66 = vector.extract_strided_slice %51 {offsets = [0, 96], sizes = [2, 32], strides = [1, 1]} : vector<2x128xf32> to vector<2x32xf32>
    %67 = arith.negf %66 : vector<2x32xf32>
    %68 = math.exp %67 : vector<2x32xf32>
    %cst_29 = arith.constant 1.000000e+00 : f32
    %69 = vector.broadcast %cst_29 : f32 to vector<2x32xf32>
    %70 = arith.addf %69, %68 : vector<2x32xf32>
    %71 = arith.divf %69, %70 : vector<2x32xf32>
    %72 = arith.mulf %63, %46 : vector<2x32xf32>
    %73 = arith.mulf %57, %65 : vector<2x32xf32>
    %74 = arith.addf %72, %73 : vector<2x32xf32>
    %75 = math.tanh %74 : vector<2x32xf32>
    %76 = arith.mulf %71, %75 : vector<2x32xf32>
    %77 = vector.extract_strided_slice %16 {offsets = [4, 0], sizes = [2, 128], strides = [1, 1]} : vector<8x128xf32> to vector<2x128xf32>
    %cst_30 = arith.constant dense<0.000000e+00> : vector<2x128xf32>
    %78 = tpu.matmul %76, %3, %cst_30 {dimension_numbers = #tpu.dot_dimension_numbers<[1], [0], [0], [1], [0, 0, 1, 1], [], []>} : vector<2x32xf32>, vector<32x128xf32>, vector<2x128xf32> -> vector<2x128xf32>
    %79 = arith.addf %77, %78 : vector<2x128xf32>
    %80 = vector.extract_strided_slice %79 {offsets = [0, 0], sizes = [2, 32], strides = [1, 1]} : vector<2x128xf32> to vector<2x32xf32>
    %81 = arith.negf %80 : vector<2x32xf32>
    %82 = math.exp %81 : vector<2x32xf32>
    %cst_31 = arith.constant 1.000000e+00 : f32
    %83 = vector.broadcast %cst_31 : f32 to vector<2x32xf32>
    %84 = arith.addf %83, %82 : vector<2x32xf32>
    %85 = arith.divf %83, %84 : vector<2x32xf32>
    %86 = vector.extract_strided_slice %79 {offsets = [0, 32], sizes = [2, 32], strides = [1, 1]} : vector<2x128xf32> to vector<2x32xf32>
    %87 = arith.negf %86 : vector<2x32xf32>
    %88 = math.exp %87 : vector<2x32xf32>
    %cst_32 = arith.constant 1.000000e+00 : f32
    %89 = vector.broadcast %cst_32 : f32 to vector<2x32xf32>
    %90 = arith.addf %89, %88 : vector<2x32xf32>
    %91 = arith.divf %89, %90 : vector<2x32xf32>
    %92 = vector.extract_strided_slice %79 {offsets = [0, 64], sizes = [2, 32], strides = [1, 1]} : vector<2x128xf32> to vector<2x32xf32>
    %93 = math.tanh %92 : vector<2x32xf32>
    %94 = vector.extract_strided_slice %79 {offsets = [0, 96], sizes = [2, 32], strides = [1, 1]} : vector<2x128xf32> to vector<2x32xf32>
    %95 = arith.negf %94 : vector<2x32xf32>
    %96 = math.exp %95 : vector<2x32xf32>
    %cst_33 = arith.constant 1.000000e+00 : f32
    %97 = vector.broadcast %cst_33 : f32 to vector<2x32xf32>
    %98 = arith.addf %97, %96 : vector<2x32xf32>
    %99 = arith.divf %97, %98 : vector<2x32xf32>
    %100 = arith.mulf %91, %74 : vector<2x32xf32>
    %101 = arith.mulf %85, %93 : vector<2x32xf32>
    %102 = arith.addf %100, %101 : vector<2x32xf32>
    %103 = math.tanh %102 : vector<2x32xf32>
    %104 = arith.mulf %99, %103 : vector<2x32xf32>
    %105 = vector.extract_strided_slice %16 {offsets = [6, 0], sizes = [2, 128], strides = [1, 1]} : vector<8x128xf32> to vector<2x128xf32>
    %cst_34 = arith.constant dense<0.000000e+00> : vector<2x128xf32>
    %106 = tpu.matmul %104, %3, %cst_34 {dimension_numbers = #tpu.dot_dimension_numbers<[1], [0], [0], [1], [0, 0, 1, 1], [], []>} : vector<2x32xf32>, vector<32x128xf32>, vector<2x128xf32> -> vector<2x128xf32>
    %107 = arith.addf %105, %106 : vector<2x128xf32>
    %108 = vector.extract_strided_slice %107 {offsets = [0, 0], sizes = [2, 32], strides = [1, 1]} : vector<2x128xf32> to vector<2x32xf32>
    %109 = arith.negf %108 : vector<2x32xf32>
    %110 = math.exp %109 : vector<2x32xf32>
    %cst_35 = arith.constant 1.000000e+00 : f32
    %111 = vector.broadcast %cst_35 : f32 to vector<2x32xf32>
    %112 = arith.addf %111, %110 : vector<2x32xf32>
    %113 = arith.divf %111, %112 : vector<2x32xf32>
    %114 = vector.extract_strided_slice %107 {offsets = [0, 32], sizes = [2, 32], strides = [1, 1]} : vector<2x128xf32> to vector<2x32xf32>
    %115 = arith.negf %114 : vector<2x32xf32>
    %116 = math.exp %115 : vector<2x32xf32>
    %cst_36 = arith.constant 1.000000e+00 : f32
    %117 = vector.broadcast %cst_36 : f32 to vector<2x32xf32>
    %118 = arith.addf %117, %116 : vector<2x32xf32>
    %119 = arith.divf %117, %118 : vector<2x32xf32>
    %120 = vector.extract_strided_slice %107 {offsets = [0, 64], sizes = [2, 32], strides = [1, 1]} : vector<2x128xf32> to vector<2x32xf32>
    %121 = math.tanh %120 : vector<2x32xf32>
    %122 = vector.extract_strided_slice %107 {offsets = [0, 96], sizes = [2, 32], strides = [1, 1]} : vector<2x128xf32> to vector<2x32xf32>
    %123 = arith.negf %122 : vector<2x32xf32>
    %124 = math.exp %123 : vector<2x32xf32>
    %cst_37 = arith.constant 1.000000e+00 : f32
    %125 = vector.broadcast %cst_37 : f32 to vector<2x32xf32>
    %126 = arith.addf %125, %124 : vector<2x32xf32>
    %127 = arith.divf %125, %126 : vector<2x32xf32>
    %128 = arith.mulf %119, %102 : vector<2x32xf32>
    %129 = arith.mulf %113, %121 : vector<2x32xf32>
    %130 = arith.addf %128, %129 : vector<2x32xf32>
    %131 = math.tanh %130 : vector<2x32xf32>
    %132 = arith.mulf %127, %131 : vector<2x32xf32>
    %c0_38 = arith.constant 0 : index
    %c0_39 = arith.constant 0 : index
    %133 = vector.load %arg1[%c0_38, %c0_39] : memref<16x8xf32, #tpu.memory_space<vmem>>, vector<16x8xf32>
    %cst_40 = arith.constant dense<0.000000e+00> : vector<16x128xf32>
    %134 = tpu.matmul %133, %1, %cst_40 {dimension_numbers = #tpu.dot_dimension_numbers<[1], [0], [0], [1], [0, 0, 1, 1], [], []>} : vector<16x8xf32>, vector<8x128xf32>, vector<16x128xf32> -> vector<16x128xf32>
    %135 = vector.broadcast %9 : vector<1x128xf32> to vector<16x128xf32>
    %136 = arith.addf %134, %135 : vector<16x128xf32>
    %c2_41 = arith.constant 2 : index
    %c0_42 = arith.constant 0 : index
    %c0_43 = arith.constant 0 : index
    %137 = vector.load %arg2[%c2_41, %c0_42, %c0_43] : memref<6x2x32xf32, #tpu.memory_space<vmem>>, vector<1x2x32xf32>
    %138 = vector.shape_cast %137 : vector<1x2x32xf32> to vector<2x32xf32>
    %c3_44 = arith.constant 3 : index
    %c0_45 = arith.constant 0 : index
    %c0_46 = arith.constant 0 : index
    %139 = vector.load %arg2[%c3_44, %c0_45, %c0_46] : memref<6x2x32xf32, #tpu.memory_space<vmem>>, vector<1x2x32xf32>
    %140 = vector.shape_cast %139 : vector<1x2x32xf32> to vector<2x32xf32>
    %141 = vector.extract_strided_slice %136 {offsets = [0, 0], sizes = [2, 128], strides = [1, 1]} : vector<16x128xf32> to vector<2x128xf32>
    %cst_47 = arith.constant dense<0.000000e+00> : vector<2x128xf32>
    %142 = tpu.matmul %138, %4, %cst_47 {dimension_numbers = #tpu.dot_dimension_numbers<[1], [0], [0], [1], [0, 0, 1, 1], [], []>} : vector<2x32xf32>, vector<32x128xf32>, vector<2x128xf32> -> vector<2x128xf32>
    %143 = arith.addf %141, %142 : vector<2x128xf32>
    %144 = vector.extract_strided_slice %143 {offsets = [0, 0], sizes = [2, 32], strides = [1, 1]} : vector<2x128xf32> to vector<2x32xf32>
    %145 = arith.negf %144 : vector<2x32xf32>
    %146 = math.exp %145 : vector<2x32xf32>
    %cst_48 = arith.constant 1.000000e+00 : f32
    %147 = vector.broadcast %cst_48 : f32 to vector<2x32xf32>
    %148 = arith.addf %147, %146 : vector<2x32xf32>
    %149 = arith.divf %147, %148 : vector<2x32xf32>
    %150 = vector.extract_strided_slice %143 {offsets = [0, 32], sizes = [2, 32], strides = [1, 1]} : vector<2x128xf32> to vector<2x32xf32>
    %151 = arith.negf %150 : vector<2x32xf32>
    %152 = math.exp %151 : vector<2x32xf32>
    %cst_49 = arith.constant 1.000000e+00 : f32
    %153 = vector.broadcast %cst_49 : f32 to vector<2x32xf32>
    %154 = arith.addf %153, %152 : vector<2x32xf32>
    %155 = arith.divf %153, %154 : vector<2x32xf32>
    %156 = vector.extract_strided_slice %143 {offsets = [0, 64], sizes = [2, 32], strides = [1, 1]} : vector<2x128xf32> to vector<2x32xf32>
    %157 = math.tanh %156 : vector<2x32xf32>
    %158 = vector.extract_strided_slice %143 {offsets = [0, 96], sizes = [2, 32], strides = [1, 1]} : vector<2x128xf32> to vector<2x32xf32>
    %159 = arith.negf %158 : vector<2x32xf32>
    %160 = math.exp %159 : vector<2x32xf32>
    %cst_50 = arith.constant 1.000000e+00 : f32
    %161 = vector.broadcast %cst_50 : f32 to vector<2x32xf32>
    %162 = arith.addf %161, %160 : vector<2x32xf32>
    %163 = arith.divf %161, %162 : vector<2x32xf32>
    %164 = arith.mulf %155, %140 : vector<2x32xf32>
    %165 = arith.mulf %149, %157 : vector<2x32xf32>
    %166 = arith.addf %164, %165 : vector<2x32xf32>
    %167 = math.tanh %166 : vector<2x32xf32>
    %168 = arith.mulf %163, %167 : vector<2x32xf32>
    %169 = vector.extract_strided_slice %136 {offsets = [2, 0], sizes = [2, 128], strides = [1, 1]} : vector<16x128xf32> to vector<2x128xf32>
    %cst_51 = arith.constant dense<0.000000e+00> : vector<2x128xf32>
    %170 = tpu.matmul %168, %4, %cst_51 {dimension_numbers = #tpu.dot_dimension_numbers<[1], [0], [0], [1], [0, 0, 1, 1], [], []>} : vector<2x32xf32>, vector<32x128xf32>, vector<2x128xf32> -> vector<2x128xf32>
    %171 = arith.addf %169, %170 : vector<2x128xf32>
    %172 = vector.extract_strided_slice %171 {offsets = [0, 0], sizes = [2, 32], strides = [1, 1]} : vector<2x128xf32> to vector<2x32xf32>
    %173 = arith.negf %172 : vector<2x32xf32>
    %174 = math.exp %173 : vector<2x32xf32>
    %cst_52 = arith.constant 1.000000e+00 : f32
    %175 = vector.broadcast %cst_52 : f32 to vector<2x32xf32>
    %176 = arith.addf %175, %174 : vector<2x32xf32>
    %177 = arith.divf %175, %176 : vector<2x32xf32>
    %178 = vector.extract_strided_slice %171 {offsets = [0, 32], sizes = [2, 32], strides = [1, 1]} : vector<2x128xf32> to vector<2x32xf32>
    %179 = arith.negf %178 : vector<2x32xf32>
    %180 = math.exp %179 : vector<2x32xf32>
    %cst_53 = arith.constant 1.000000e+00 : f32
    %181 = vector.broadcast %cst_53 : f32 to vector<2x32xf32>
    %182 = arith.addf %181, %180 : vector<2x32xf32>
    %183 = arith.divf %181, %182 : vector<2x32xf32>
    %184 = vector.extract_strided_slice %171 {offsets = [0, 64], sizes = [2, 32], strides = [1, 1]} : vector<2x128xf32> to vector<2x32xf32>
    %185 = math.tanh %184 : vector<2x32xf32>
    %186 = vector.extract_strided_slice %171 {offsets = [0, 96], sizes = [2, 32], strides = [1, 1]} : vector<2x128xf32> to vector<2x32xf32>
    %187 = arith.negf %186 : vector<2x32xf32>
    %188 = math.exp %187 : vector<2x32xf32>
    %cst_54 = arith.constant 1.000000e+00 : f32
    %189 = vector.broadcast %cst_54 : f32 to vector<2x32xf32>
    %190 = arith.addf %189, %188 : vector<2x32xf32>
    %191 = arith.divf %189, %190 : vector<2x32xf32>
    %192 = arith.mulf %183, %166 : vector<2x32xf32>
    %193 = arith.mulf %177, %185 : vector<2x32xf32>
    %194 = arith.addf %192, %193 : vector<2x32xf32>
    %195 = math.tanh %194 : vector<2x32xf32>
    %196 = arith.mulf %191, %195 : vector<2x32xf32>
    %197 = vector.extract_strided_slice %136 {offsets = [4, 0], sizes = [2, 128], strides = [1, 1]} : vector<16x128xf32> to vector<2x128xf32>
    %cst_55 = arith.constant dense<0.000000e+00> : vector<2x128xf32>
    %198 = tpu.matmul %196, %4, %cst_55 {dimension_numbers = #tpu.dot_dimension_numbers<[1], [0], [0], [1], [0, 0, 1, 1], [], []>} : vector<2x32xf32>, vector<32x128xf32>, vector<2x128xf32> -> vector<2x128xf32>
    %199 = arith.addf %197, %198 : vector<2x128xf32>
    %200 = vector.extract_strided_slice %199 {offsets = [0, 0], sizes = [2, 32], strides = [1, 1]} : vector<2x128xf32> to vector<2x32xf32>
    %201 = arith.negf %200 : vector<2x32xf32>
    %202 = math.exp %201 : vector<2x32xf32>
    %cst_56 = arith.constant 1.000000e+00 : f32
    %203 = vector.broadcast %cst_56 : f32 to vector<2x32xf32>
    %204 = arith.addf %203, %202 : vector<2x32xf32>
    %205 = arith.divf %203, %204 : vector<2x32xf32>
    %206 = vector.extract_strided_slice %199 {offsets = [0, 32], sizes = [2, 32], strides = [1, 1]} : vector<2x128xf32> to vector<2x32xf32>
    %207 = arith.negf %206 : vector<2x32xf32>
    %208 = math.exp %207 : vector<2x32xf32>
    %cst_57 = arith.constant 1.000000e+00 : f32
    %209 = vector.broadcast %cst_57 : f32 to vector<2x32xf32>
    %210 = arith.addf %209, %208 : vector<2x32xf32>
    %211 = arith.divf %209, %210 : vector<2x32xf32>
    %212 = vector.extract_strided_slice %199 {offsets = [0, 64], sizes = [2, 32], strides = [1, 1]} : vector<2x128xf32> to vector<2x32xf32>
    %213 = math.tanh %212 : vector<2x32xf32>
    %214 = vector.extract_strided_slice %199 {offsets = [0, 96], sizes = [2, 32], strides = [1, 1]} : vector<2x128xf32> to vector<2x32xf32>
    %215 = arith.negf %214 : vector<2x32xf32>
    %216 = math.exp %215 : vector<2x32xf32>
    %cst_58 = arith.constant 1.000000e+00 : f32
    %217 = vector.broadcast %cst_58 : f32 to vector<2x32xf32>
    %218 = arith.addf %217, %216 : vector<2x32xf32>
    %219 = arith.divf %217, %218 : vector<2x32xf32>
    %220 = arith.mulf %211, %194 : vector<2x32xf32>
    %221 = arith.mulf %205, %213 : vector<2x32xf32>
    %222 = arith.addf %220, %221 : vector<2x32xf32>
    %223 = math.tanh %222 : vector<2x32xf32>
    %224 = arith.mulf %219, %223 : vector<2x32xf32>
    %225 = vector.extract_strided_slice %136 {offsets = [6, 0], sizes = [2, 128], strides = [1, 1]} : vector<16x128xf32> to vector<2x128xf32>
    %cst_59 = arith.constant dense<0.000000e+00> : vector<2x128xf32>
    %226 = tpu.matmul %224, %4, %cst_59 {dimension_numbers = #tpu.dot_dimension_numbers<[1], [0], [0], [1], [0, 0, 1, 1], [], []>} : vector<2x32xf32>, vector<32x128xf32>, vector<2x128xf32> -> vector<2x128xf32>
    %227 = arith.addf %225, %226 : vector<2x128xf32>
    %228 = vector.extract_strided_slice %227 {offsets = [0, 0], sizes = [2, 32], strides = [1, 1]} : vector<2x128xf32> to vector<2x32xf32>
    %229 = arith.negf %228 : vector<2x32xf32>
    %230 = math.exp %229 : vector<2x32xf32>
    %cst_60 = arith.constant 1.000000e+00 : f32
    %231 = vector.broadcast %cst_60 : f32 to vector<2x32xf32>
    %232 = arith.addf %231, %230 : vector<2x32xf32>
    %233 = arith.divf %231, %232 : vector<2x32xf32>
    %234 = vector.extract_strided_slice %227 {offsets = [0, 32], sizes = [2, 32], strides = [1, 1]} : vector<2x128xf32> to vector<2x32xf32>
    %235 = arith.negf %234 : vector<2x32xf32>
    %236 = math.exp %235 : vector<2x32xf32>
    %cst_61 = arith.constant 1.000000e+00 : f32
    %237 = vector.broadcast %cst_61 : f32 to vector<2x32xf32>
    %238 = arith.addf %237, %236 : vector<2x32xf32>
    %239 = arith.divf %237, %238 : vector<2x32xf32>
    %240 = vector.extract_strided_slice %227 {offsets = [0, 64], sizes = [2, 32], strides = [1, 1]} : vector<2x128xf32> to vector<2x32xf32>
    %241 = math.tanh %240 : vector<2x32xf32>
    %242 = vector.extract_strided_slice %227 {offsets = [0, 96], sizes = [2, 32], strides = [1, 1]} : vector<2x128xf32> to vector<2x32xf32>
    %243 = arith.negf %242 : vector<2x32xf32>
    %244 = math.exp %243 : vector<2x32xf32>
    %cst_62 = arith.constant 1.000000e+00 : f32
    %245 = vector.broadcast %cst_62 : f32 to vector<2x32xf32>
    %246 = arith.addf %245, %244 : vector<2x32xf32>
    %247 = arith.divf %245, %246 : vector<2x32xf32>
    %248 = arith.mulf %239, %222 : vector<2x32xf32>
    %249 = arith.mulf %233, %241 : vector<2x32xf32>
    %250 = arith.addf %248, %249 : vector<2x32xf32>
    %251 = math.tanh %250 : vector<2x32xf32>
    %252 = arith.mulf %247, %251 : vector<2x32xf32>
    %253 = vector.extract_strided_slice %136 {offsets = [8, 0], sizes = [2, 128], strides = [1, 1]} : vector<16x128xf32> to vector<2x128xf32>
    %cst_63 = arith.constant dense<0.000000e+00> : vector<2x128xf32>
    %254 = tpu.matmul %252, %4, %cst_63 {dimension_numbers = #tpu.dot_dimension_numbers<[1], [0], [0], [1], [0, 0, 1, 1], [], []>} : vector<2x32xf32>, vector<32x128xf32>, vector<2x128xf32> -> vector<2x128xf32>
    %255 = arith.addf %253, %254 : vector<2x128xf32>
    %256 = vector.extract_strided_slice %255 {offsets = [0, 0], sizes = [2, 32], strides = [1, 1]} : vector<2x128xf32> to vector<2x32xf32>
    %257 = arith.negf %256 : vector<2x32xf32>
    %258 = math.exp %257 : vector<2x32xf32>
    %cst_64 = arith.constant 1.000000e+00 : f32
    %259 = vector.broadcast %cst_64 : f32 to vector<2x32xf32>
    %260 = arith.addf %259, %258 : vector<2x32xf32>
    %261 = arith.divf %259, %260 : vector<2x32xf32>
    %262 = vector.extract_strided_slice %255 {offsets = [0, 32], sizes = [2, 32], strides = [1, 1]} : vector<2x128xf32> to vector<2x32xf32>
    %263 = arith.negf %262 : vector<2x32xf32>
    %264 = math.exp %263 : vector<2x32xf32>
    %cst_65 = arith.constant 1.000000e+00 : f32
    %265 = vector.broadcast %cst_65 : f32 to vector<2x32xf32>
    %266 = arith.addf %265, %264 : vector<2x32xf32>
    %267 = arith.divf %265, %266 : vector<2x32xf32>
    %268 = vector.extract_strided_slice %255 {offsets = [0, 64], sizes = [2, 32], strides = [1, 1]} : vector<2x128xf32> to vector<2x32xf32>
    %269 = math.tanh %268 : vector<2x32xf32>
    %270 = vector.extract_strided_slice %255 {offsets = [0, 96], sizes = [2, 32], strides = [1, 1]} : vector<2x128xf32> to vector<2x32xf32>
    %271 = arith.negf %270 : vector<2x32xf32>
    %272 = math.exp %271 : vector<2x32xf32>
    %cst_66 = arith.constant 1.000000e+00 : f32
    %273 = vector.broadcast %cst_66 : f32 to vector<2x32xf32>
    %274 = arith.addf %273, %272 : vector<2x32xf32>
    %275 = arith.divf %273, %274 : vector<2x32xf32>
    %276 = arith.mulf %267, %250 : vector<2x32xf32>
    %277 = arith.mulf %261, %269 : vector<2x32xf32>
    %278 = arith.addf %276, %277 : vector<2x32xf32>
    %279 = math.tanh %278 : vector<2x32xf32>
    %280 = arith.mulf %275, %279 : vector<2x32xf32>
    %281 = vector.extract_strided_slice %136 {offsets = [10, 0], sizes = [2, 128], strides = [1, 1]} : vector<16x128xf32> to vector<2x128xf32>
    %cst_67 = arith.constant dense<0.000000e+00> : vector<2x128xf32>
    %282 = tpu.matmul %280, %4, %cst_67 {dimension_numbers = #tpu.dot_dimension_numbers<[1], [0], [0], [1], [0, 0, 1, 1], [], []>} : vector<2x32xf32>, vector<32x128xf32>, vector<2x128xf32> -> vector<2x128xf32>
    %283 = arith.addf %281, %282 : vector<2x128xf32>
    %284 = vector.extract_strided_slice %283 {offsets = [0, 0], sizes = [2, 32], strides = [1, 1]} : vector<2x128xf32> to vector<2x32xf32>
    %285 = arith.negf %284 : vector<2x32xf32>
    %286 = math.exp %285 : vector<2x32xf32>
    %cst_68 = arith.constant 1.000000e+00 : f32
    %287 = vector.broadcast %cst_68 : f32 to vector<2x32xf32>
    %288 = arith.addf %287, %286 : vector<2x32xf32>
    %289 = arith.divf %287, %288 : vector<2x32xf32>
    %290 = vector.extract_strided_slice %283 {offsets = [0, 32], sizes = [2, 32], strides = [1, 1]} : vector<2x128xf32> to vector<2x32xf32>
    %291 = arith.negf %290 : vector<2x32xf32>
    %292 = math.exp %291 : vector<2x32xf32>
    %cst_69 = arith.constant 1.000000e+00 : f32
    %293 = vector.broadcast %cst_69 : f32 to vector<2x32xf32>
    %294 = arith.addf %293, %292 : vector<2x32xf32>
    %295 = arith.divf %293, %294 : vector<2x32xf32>
    %296 = vector.extract_strided_slice %283 {offsets = [0, 64], sizes = [2, 32], strides = [1, 1]} : vector<2x128xf32> to vector<2x32xf32>
    %297 = math.tanh %296 : vector<2x32xf32>
    %298 = vector.extract_strided_slice %283 {offsets = [0, 96], sizes = [2, 32], strides = [1, 1]} : vector<2x128xf32> to vector<2x32xf32>
    %299 = arith.negf %298 : vector<2x32xf32>
    %300 = math.exp %299 : vector<2x32xf32>
    %cst_70 = arith.constant 1.000000e+00 : f32
    %301 = vector.broadcast %cst_70 : f32 to vector<2x32xf32>
    %302 = arith.addf %301, %300 : vector<2x32xf32>
    %303 = arith.divf %301, %302 : vector<2x32xf32>
    %304 = arith.mulf %295, %278 : vector<2x32xf32>
    %305 = arith.mulf %289, %297 : vector<2x32xf32>
    %306 = arith.addf %304, %305 : vector<2x32xf32>
    %307 = math.tanh %306 : vector<2x32xf32>
    %308 = arith.mulf %303, %307 : vector<2x32xf32>
    %309 = vector.extract_strided_slice %136 {offsets = [12, 0], sizes = [2, 128], strides = [1, 1]} : vector<16x128xf32> to vector<2x128xf32>
    %cst_71 = arith.constant dense<0.000000e+00> : vector<2x128xf32>
    %310 = tpu.matmul %308, %4, %cst_71 {dimension_numbers = #tpu.dot_dimension_numbers<[1], [0], [0], [1], [0, 0, 1, 1], [], []>} : vector<2x32xf32>, vector<32x128xf32>, vector<2x128xf32> -> vector<2x128xf32>
    %311 = arith.addf %309, %310 : vector<2x128xf32>
    %312 = vector.extract_strided_slice %311 {offsets = [0, 0], sizes = [2, 32], strides = [1, 1]} : vector<2x128xf32> to vector<2x32xf32>
    %313 = arith.negf %312 : vector<2x32xf32>
    %314 = math.exp %313 : vector<2x32xf32>
    %cst_72 = arith.constant 1.000000e+00 : f32
    %315 = vector.broadcast %cst_72 : f32 to vector<2x32xf32>
    %316 = arith.addf %315, %314 : vector<2x32xf32>
    %317 = arith.divf %315, %316 : vector<2x32xf32>
    %318 = vector.extract_strided_slice %311 {offsets = [0, 32], sizes = [2, 32], strides = [1, 1]} : vector<2x128xf32> to vector<2x32xf32>
    %319 = arith.negf %318 : vector<2x32xf32>
    %320 = math.exp %319 : vector<2x32xf32>
    %cst_73 = arith.constant 1.000000e+00 : f32
    %321 = vector.broadcast %cst_73 : f32 to vector<2x32xf32>
    %322 = arith.addf %321, %320 : vector<2x32xf32>
    %323 = arith.divf %321, %322 : vector<2x32xf32>
    %324 = vector.extract_strided_slice %311 {offsets = [0, 64], sizes = [2, 32], strides = [1, 1]} : vector<2x128xf32> to vector<2x32xf32>
    %325 = math.tanh %324 : vector<2x32xf32>
    %326 = vector.extract_strided_slice %311 {offsets = [0, 96], sizes = [2, 32], strides = [1, 1]} : vector<2x128xf32> to vector<2x32xf32>
    %327 = arith.negf %326 : vector<2x32xf32>
    %328 = math.exp %327 : vector<2x32xf32>
    %cst_74 = arith.constant 1.000000e+00 : f32
    %329 = vector.broadcast %cst_74 : f32 to vector<2x32xf32>
    %330 = arith.addf %329, %328 : vector<2x32xf32>
    %331 = arith.divf %329, %330 : vector<2x32xf32>
    %332 = arith.mulf %323, %306 : vector<2x32xf32>
    %333 = arith.mulf %317, %325 : vector<2x32xf32>
    %334 = arith.addf %332, %333 : vector<2x32xf32>
    %335 = math.tanh %334 : vector<2x32xf32>
    %336 = arith.mulf %331, %335 : vector<2x32xf32>
    %337 = vector.extract_strided_slice %136 {offsets = [14, 0], sizes = [2, 128], strides = [1, 1]} : vector<16x128xf32> to vector<2x128xf32>
    %cst_75 = arith.constant dense<0.000000e+00> : vector<2x128xf32>
    %338 = tpu.matmul %336, %4, %cst_75 {dimension_numbers = #tpu.dot_dimension_numbers<[1], [0], [0], [1], [0, 0, 1, 1], [], []>} : vector<2x32xf32>, vector<32x128xf32>, vector<2x128xf32> -> vector<2x128xf32>
    %339 = arith.addf %337, %338 : vector<2x128xf32>
    %340 = vector.extract_strided_slice %339 {offsets = [0, 0], sizes = [2, 32], strides = [1, 1]} : vector<2x128xf32> to vector<2x32xf32>
    %341 = arith.negf %340 : vector<2x32xf32>
    %342 = math.exp %341 : vector<2x32xf32>
    %cst_76 = arith.constant 1.000000e+00 : f32
    %343 = vector.broadcast %cst_76 : f32 to vector<2x32xf32>
    %344 = arith.addf %343, %342 : vector<2x32xf32>
    %345 = arith.divf %343, %344 : vector<2x32xf32>
    %346 = vector.extract_strided_slice %339 {offsets = [0, 32], sizes = [2, 32], strides = [1, 1]} : vector<2x128xf32> to vector<2x32xf32>
    %347 = arith.negf %346 : vector<2x32xf32>
    %348 = math.exp %347 : vector<2x32xf32>
    %cst_77 = arith.constant 1.000000e+00 : f32
    %349 = vector.broadcast %cst_77 : f32 to vector<2x32xf32>
    %350 = arith.addf %349, %348 : vector<2x32xf32>
    %351 = arith.divf %349, %350 : vector<2x32xf32>
    %352 = vector.extract_strided_slice %339 {offsets = [0, 64], sizes = [2, 32], strides = [1, 1]} : vector<2x128xf32> to vector<2x32xf32>
    %353 = math.tanh %352 : vector<2x32xf32>
    %354 = vector.extract_strided_slice %339 {offsets = [0, 96], sizes = [2, 32], strides = [1, 1]} : vector<2x128xf32> to vector<2x32xf32>
    %355 = arith.negf %354 : vector<2x32xf32>
    %356 = math.exp %355 : vector<2x32xf32>
    %cst_78 = arith.constant 1.000000e+00 : f32
    %357 = vector.broadcast %cst_78 : f32 to vector<2x32xf32>
    %358 = arith.addf %357, %356 : vector<2x32xf32>
    %359 = arith.divf %357, %358 : vector<2x32xf32>
    %360 = arith.mulf %351, %334 : vector<2x32xf32>
    %361 = arith.mulf %345, %353 : vector<2x32xf32>
    %362 = arith.addf %360, %361 : vector<2x32xf32>
    %363 = math.tanh %362 : vector<2x32xf32>
    %364 = arith.mulf %359, %363 : vector<2x32xf32>
    %365 = tpu.concatenate %48, %76, %104, %132 in 0 : vector<2x32xf32>, vector<2x32xf32>, vector<2x32xf32>, vector<2x32xf32> -> vector<8x32xf32>
    %366 = tpu.concatenate %280, %308, %336, %364 in 0 : vector<2x32xf32>, vector<2x32xf32>, vector<2x32xf32>, vector<2x32xf32> -> vector<8x32xf32>
    %367 = tpu.concatenate %365, %366 in 1 : vector<8x32xf32>, vector<8x32xf32> -> vector<8x64xf32>
    %cst_79 = arith.constant dense<0.000000e+00> : vector<8x128xf32>
    %368 = tpu.matmul %367, %2, %cst_79 {dimension_numbers = #tpu.dot_dimension_numbers<[1], [0], [0], [1], [0, 0, 1, 1], [], []>} : vector<8x64xf32>, vector<64x128xf32>, vector<8x128xf32> -> vector<8x128xf32>
    %369 = vector.broadcast %10 : vector<1x128xf32> to vector<8x128xf32>
    %370 = arith.addf %368, %369 : vector<8x128xf32>
    %c4_80 = arith.constant 4 : index
    %c0_81 = arith.constant 0 : index
    %c0_82 = arith.constant 0 : index
    %371 = vector.load %arg2[%c4_80, %c0_81, %c0_82] : memref<6x2x32xf32, #tpu.memory_space<vmem>>, vector<1x2x32xf32>
    %372 = vector.shape_cast %371 : vector<1x2x32xf32> to vector<2x32xf32>
    %c5 = arith.constant 5 : index
    %c0_83 = arith.constant 0 : index
    %c0_84 = arith.constant 0 : index
    %373 = vector.load %arg2[%c5, %c0_83, %c0_84] : memref<6x2x32xf32, #tpu.memory_space<vmem>>, vector<1x2x32xf32>
    %374 = vector.shape_cast %373 : vector<1x2x32xf32> to vector<2x32xf32>
    %375 = vector.extract_strided_slice %370 {offsets = [0, 0], sizes = [2, 128], strides = [1, 1]} : vector<8x128xf32> to vector<2x128xf32>
    %cst_85 = arith.constant dense<0.000000e+00> : vector<2x128xf32>
    %376 = tpu.matmul %372, %5, %cst_85 {dimension_numbers = #tpu.dot_dimension_numbers<[1], [0], [0], [1], [0, 0, 1, 1], [], []>} : vector<2x32xf32>, vector<32x128xf32>, vector<2x128xf32> -> vector<2x128xf32>
    %377 = arith.addf %375, %376 : vector<2x128xf32>
    %378 = vector.extract_strided_slice %377 {offsets = [0, 0], sizes = [2, 32], strides = [1, 1]} : vector<2x128xf32> to vector<2x32xf32>
    %379 = arith.negf %378 : vector<2x32xf32>
    %380 = math.exp %379 : vector<2x32xf32>
    %cst_86 = arith.constant 1.000000e+00 : f32
    %381 = vector.broadcast %cst_86 : f32 to vector<2x32xf32>
    %382 = arith.addf %381, %380 : vector<2x32xf32>
    %383 = arith.divf %381, %382 : vector<2x32xf32>
    %384 = vector.extract_strided_slice %377 {offsets = [0, 32], sizes = [2, 32], strides = [1, 1]} : vector<2x128xf32> to vector<2x32xf32>
    %385 = arith.negf %384 : vector<2x32xf32>
    %386 = math.exp %385 : vector<2x32xf32>
    %cst_87 = arith.constant 1.000000e+00 : f32
    %387 = vector.broadcast %cst_87 : f32 to vector<2x32xf32>
    %388 = arith.addf %387, %386 : vector<2x32xf32>
    %389 = arith.divf %387, %388 : vector<2x32xf32>
    %390 = vector.extract_strided_slice %377 {offsets = [0, 64], sizes = [2, 32], strides = [1, 1]} : vector<2x128xf32> to vector<2x32xf32>
    %391 = math.tanh %390 : vector<2x32xf32>
    %392 = vector.extract_strided_slice %377 {offsets = [0, 96], sizes = [2, 32], strides = [1, 1]} : vector<2x128xf32> to vector<2x32xf32>
    %393 = arith.negf %392 : vector<2x32xf32>
    %394 = math.exp %393 : vector<2x32xf32>
    %cst_88 = arith.constant 1.000000e+00 : f32
    %395 = vector.broadcast %cst_88 : f32 to vector<2x32xf32>
    %396 = arith.addf %395, %394 : vector<2x32xf32>
    %397 = arith.divf %395, %396 : vector<2x32xf32>
    %398 = arith.mulf %389, %374 : vector<2x32xf32>
    %399 = arith.mulf %383, %391 : vector<2x32xf32>
    %400 = arith.addf %398, %399 : vector<2x32xf32>
    %401 = math.tanh %400 : vector<2x32xf32>
    %402 = arith.mulf %397, %401 : vector<2x32xf32>
    %403 = vector.extract_strided_slice %370 {offsets = [2, 0], sizes = [2, 128], strides = [1, 1]} : vector<8x128xf32> to vector<2x128xf32>
    %cst_89 = arith.constant dense<0.000000e+00> : vector<2x128xf32>
    %404 = tpu.matmul %402, %5, %cst_89 {dimension_numbers = #tpu.dot_dimension_numbers<[1], [0], [0], [1], [0, 0, 1, 1], [], []>} : vector<2x32xf32>, vector<32x128xf32>, vector<2x128xf32> -> vector<2x128xf32>
    %405 = arith.addf %403, %404 : vector<2x128xf32>
    %406 = vector.extract_strided_slice %405 {offsets = [0, 0], sizes = [2, 32], strides = [1, 1]} : vector<2x128xf32> to vector<2x32xf32>
    %407 = arith.negf %406 : vector<2x32xf32>
    %408 = math.exp %407 : vector<2x32xf32>
    %cst_90 = arith.constant 1.000000e+00 : f32
    %409 = vector.broadcast %cst_90 : f32 to vector<2x32xf32>
    %410 = arith.addf %409, %408 : vector<2x32xf32>
    %411 = arith.divf %409, %410 : vector<2x32xf32>
    %412 = vector.extract_strided_slice %405 {offsets = [0, 32], sizes = [2, 32], strides = [1, 1]} : vector<2x128xf32> to vector<2x32xf32>
    %413 = arith.negf %412 : vector<2x32xf32>
    %414 = math.exp %413 : vector<2x32xf32>
    %cst_91 = arith.constant 1.000000e+00 : f32
    %415 = vector.broadcast %cst_91 : f32 to vector<2x32xf32>
    %416 = arith.addf %415, %414 : vector<2x32xf32>
    %417 = arith.divf %415, %416 : vector<2x32xf32>
    %418 = vector.extract_strided_slice %405 {offsets = [0, 64], sizes = [2, 32], strides = [1, 1]} : vector<2x128xf32> to vector<2x32xf32>
    %419 = math.tanh %418 : vector<2x32xf32>
    %420 = vector.extract_strided_slice %405 {offsets = [0, 96], sizes = [2, 32], strides = [1, 1]} : vector<2x128xf32> to vector<2x32xf32>
    %421 = arith.negf %420 : vector<2x32xf32>
    %422 = math.exp %421 : vector<2x32xf32>
    %cst_92 = arith.constant 1.000000e+00 : f32
    %423 = vector.broadcast %cst_92 : f32 to vector<2x32xf32>
    %424 = arith.addf %423, %422 : vector<2x32xf32>
    %425 = arith.divf %423, %424 : vector<2x32xf32>
    %426 = arith.mulf %417, %400 : vector<2x32xf32>
    %427 = arith.mulf %411, %419 : vector<2x32xf32>
    %428 = arith.addf %426, %427 : vector<2x32xf32>
    %429 = math.tanh %428 : vector<2x32xf32>
    %430 = arith.mulf %425, %429 : vector<2x32xf32>
    %431 = vector.extract_strided_slice %370 {offsets = [4, 0], sizes = [2, 128], strides = [1, 1]} : vector<8x128xf32> to vector<2x128xf32>
    %cst_93 = arith.constant dense<0.000000e+00> : vector<2x128xf32>
    %432 = tpu.matmul %430, %5, %cst_93 {dimension_numbers = #tpu.dot_dimension_numbers<[1], [0], [0], [1], [0, 0, 1, 1], [], []>} : vector<2x32xf32>, vector<32x128xf32>, vector<2x128xf32> -> vector<2x128xf32>
    %433 = arith.addf %431, %432 : vector<2x128xf32>
    %434 = vector.extract_strided_slice %433 {offsets = [0, 0], sizes = [2, 32], strides = [1, 1]} : vector<2x128xf32> to vector<2x32xf32>
    %435 = arith.negf %434 : vector<2x32xf32>
    %436 = math.exp %435 : vector<2x32xf32>
    %cst_94 = arith.constant 1.000000e+00 : f32
    %437 = vector.broadcast %cst_94 : f32 to vector<2x32xf32>
    %438 = arith.addf %437, %436 : vector<2x32xf32>
    %439 = arith.divf %437, %438 : vector<2x32xf32>
    %440 = vector.extract_strided_slice %433 {offsets = [0, 32], sizes = [2, 32], strides = [1, 1]} : vector<2x128xf32> to vector<2x32xf32>
    %441 = arith.negf %440 : vector<2x32xf32>
    %442 = math.exp %441 : vector<2x32xf32>
    %cst_95 = arith.constant 1.000000e+00 : f32
    %443 = vector.broadcast %cst_95 : f32 to vector<2x32xf32>
    %444 = arith.addf %443, %442 : vector<2x32xf32>
    %445 = arith.divf %443, %444 : vector<2x32xf32>
    %446 = vector.extract_strided_slice %433 {offsets = [0, 64], sizes = [2, 32], strides = [1, 1]} : vector<2x128xf32> to vector<2x32xf32>
    %447 = math.tanh %446 : vector<2x32xf32>
    %448 = vector.extract_strided_slice %433 {offsets = [0, 96], sizes = [2, 32], strides = [1, 1]} : vector<2x128xf32> to vector<2x32xf32>
    %449 = arith.negf %448 : vector<2x32xf32>
    %450 = math.exp %449 : vector<2x32xf32>
    %cst_96 = arith.constant 1.000000e+00 : f32
    %451 = vector.broadcast %cst_96 : f32 to vector<2x32xf32>
    %452 = arith.addf %451, %450 : vector<2x32xf32>
    %453 = arith.divf %451, %452 : vector<2x32xf32>
    %454 = arith.mulf %445, %428 : vector<2x32xf32>
    %455 = arith.mulf %439, %447 : vector<2x32xf32>
    %456 = arith.addf %454, %455 : vector<2x32xf32>
    %457 = math.tanh %456 : vector<2x32xf32>
    %458 = arith.mulf %453, %457 : vector<2x32xf32>
    %459 = vector.extract_strided_slice %370 {offsets = [6, 0], sizes = [2, 128], strides = [1, 1]} : vector<8x128xf32> to vector<2x128xf32>
    %cst_97 = arith.constant dense<0.000000e+00> : vector<2x128xf32>
    %460 = tpu.matmul %458, %5, %cst_97 {dimension_numbers = #tpu.dot_dimension_numbers<[1], [0], [0], [1], [0, 0, 1, 1], [], []>} : vector<2x32xf32>, vector<32x128xf32>, vector<2x128xf32> -> vector<2x128xf32>
    %461 = arith.addf %459, %460 : vector<2x128xf32>
    %462 = vector.extract_strided_slice %461 {offsets = [0, 0], sizes = [2, 32], strides = [1, 1]} : vector<2x128xf32> to vector<2x32xf32>
    %463 = arith.negf %462 : vector<2x32xf32>
    %464 = math.exp %463 : vector<2x32xf32>
    %cst_98 = arith.constant 1.000000e+00 : f32
    %465 = vector.broadcast %cst_98 : f32 to vector<2x32xf32>
    %466 = arith.addf %465, %464 : vector<2x32xf32>
    %467 = arith.divf %465, %466 : vector<2x32xf32>
    %468 = vector.extract_strided_slice %461 {offsets = [0, 32], sizes = [2, 32], strides = [1, 1]} : vector<2x128xf32> to vector<2x32xf32>
    %469 = arith.negf %468 : vector<2x32xf32>
    %470 = math.exp %469 : vector<2x32xf32>
    %cst_99 = arith.constant 1.000000e+00 : f32
    %471 = vector.broadcast %cst_99 : f32 to vector<2x32xf32>
    %472 = arith.addf %471, %470 : vector<2x32xf32>
    %473 = arith.divf %471, %472 : vector<2x32xf32>
    %474 = vector.extract_strided_slice %461 {offsets = [0, 64], sizes = [2, 32], strides = [1, 1]} : vector<2x128xf32> to vector<2x32xf32>
    %475 = math.tanh %474 : vector<2x32xf32>
    %476 = vector.extract_strided_slice %461 {offsets = [0, 96], sizes = [2, 32], strides = [1, 1]} : vector<2x128xf32> to vector<2x32xf32>
    %477 = arith.negf %476 : vector<2x32xf32>
    %478 = math.exp %477 : vector<2x32xf32>
    %cst_100 = arith.constant 1.000000e+00 : f32
    %479 = vector.broadcast %cst_100 : f32 to vector<2x32xf32>
    %480 = arith.addf %479, %478 : vector<2x32xf32>
    %481 = arith.divf %479, %480 : vector<2x32xf32>
    %482 = arith.mulf %473, %456 : vector<2x32xf32>
    %483 = arith.mulf %467, %475 : vector<2x32xf32>
    %484 = arith.addf %482, %483 : vector<2x32xf32>
    %485 = math.tanh %484 : vector<2x32xf32>
    %486 = arith.mulf %481, %485 : vector<2x32xf32>
    %487 = vector.extract_strided_slice %402 {offsets = [0, 0], sizes = [1, 32], strides = [1, 1]} : vector<2x32xf32> to vector<1x32xf32>
    %488 = vector.extract_strided_slice %430 {offsets = [0, 0], sizes = [1, 32], strides = [1, 1]} : vector<2x32xf32> to vector<1x32xf32>
    %489 = vector.extract_strided_slice %458 {offsets = [0, 0], sizes = [1, 32], strides = [1, 1]} : vector<2x32xf32> to vector<1x32xf32>
    %490 = vector.extract_strided_slice %486 {offsets = [0, 0], sizes = [1, 32], strides = [1, 1]} : vector<2x32xf32> to vector<1x32xf32>
    %491 = vector.extract_strided_slice %402 {offsets = [1, 0], sizes = [1, 32], strides = [1, 1]} : vector<2x32xf32> to vector<1x32xf32>
    %492 = vector.extract_strided_slice %430 {offsets = [1, 0], sizes = [1, 32], strides = [1, 1]} : vector<2x32xf32> to vector<1x32xf32>
    %493 = vector.extract_strided_slice %458 {offsets = [1, 0], sizes = [1, 32], strides = [1, 1]} : vector<2x32xf32> to vector<1x32xf32>
    %494 = vector.extract_strided_slice %486 {offsets = [1, 0], sizes = [1, 32], strides = [1, 1]} : vector<2x32xf32> to vector<1x32xf32>
    %495 = tpu.concatenate %487, %488, %489, %490, %491, %492, %493, %494 in 0 : vector<1x32xf32>, vector<1x32xf32>, vector<1x32xf32>, vector<1x32xf32>, vector<1x32xf32>, vector<1x32xf32>, vector<1x32xf32>, vector<1x32xf32> -> vector<8x32xf32>
    %cst_101 = arith.constant dense<0.000000e+00> : vector<8x128xf32>
    %496 = tpu.matmul %495, %6, %cst_101 {dimension_numbers = #tpu.dot_dimension_numbers<[1], [0], [0], [1], [0, 0, 1, 1], [], []>} : vector<8x32xf32>, vector<32x128xf32>, vector<8x128xf32> -> vector<8x128xf32>
    %497 = vector.broadcast %11 : vector<1x128xf32> to vector<8x128xf32>
    %498 = arith.addf %496, %497 : vector<8x128xf32>
    %cst_102 = arith.constant 0.000000e+00 : f32
    %499 = vector.broadcast %cst_102 : f32 to vector<8x128xf32>
    %500 = arith.maximumf %498, %499 : vector<8x128xf32>
    %cst_103 = arith.constant dense<0.000000e+00> : vector<8x128xf32>
    %501 = tpu.matmul %500, %7, %cst_103 {dimension_numbers = #tpu.dot_dimension_numbers<[1], [0], [0], [1], [0, 0, 1, 1], [], []>} : vector<8x128xf32>, vector<128x128xf32>, vector<8x128xf32> -> vector<8x128xf32>
    %502 = vector.broadcast %12 : vector<1x128xf32> to vector<8x128xf32>
    %503 = arith.addf %501, %502 : vector<8x128xf32>
    %c0_104 = arith.constant 0 : index
    %c0_105 = arith.constant 0 : index
    %504 = vector.load %arg5[%c0_104, %c0_105] : memref<12x128xf32, #tpu.memory_space<vmem>>, vector<8x128xf32>
    tpu.vector_store %arg5[%c0_104, %c0_105], %503 {strides = array<i32>} : memref<12x128xf32, #tpu.memory_space<vmem>>, vector<8x128xf32>,
    %505 = tpu.concatenate %132, %130, %364, %362 in 1 : vector<2x32xf32>, vector<2x32xf32>, vector<2x32xf32>, vector<2x32xf32> -> vector<2x128xf32>
    %c8_106 = arith.constant 8 : index
    %c0_107 = arith.constant 0 : index
    %506 = vector.load %arg5[%c8_106, %c0_107] : memref<12x128xf32, #tpu.memory_space<vmem>>, vector<2x128xf32>
    tpu.vector_store %arg5[%c8_106, %c0_107], %505 {strides = array<i32>} : memref<12x128xf32, #tpu.memory_space<vmem>>, vector<2x128xf32>,
    %cst_108 = arith.constant 0.000000e+00 : f32
    %507 = vector.broadcast %cst_108 : f32 to vector<2x64xf32>
    %508 = tpu.concatenate %486, %484, %507 in 1 : vector<2x32xf32>, vector<2x32xf32>, vector<2x64xf32> -> vector<2x128xf32>
    %c10 = arith.constant 10 : index
    %c0_109 = arith.constant 0 : index
    %509 = vector.load %arg5[%c10, %c0_109] : memref<12x128xf32, #tpu.memory_space<vmem>>, vector<2x128xf32>
    tpu.vector_store %arg5[%c10, %c0_109], %508 {strides = array<i32>} : memref<12x128xf32, #tpu.memory_space<vmem>>, vector<2x128xf32>,
    return
  }
}

</mosaic_0001>

<bundles_post_ra>
// kernel: atten_clstm_forward.1
= control target key start
LH: loop header
LB: loop body
LE: loop exit
PB: predicated region body
PF: predicated region fallthrough
CT: control target
= control target key end

     0   :  { %10 = vsyncpa [#allocation3], 0  ;;  %s2965_s18 = smov [#allocation2]   ;;  %s3366_s0 = inlined_call_operand.vmem [shape: f32[8,8], index: 0, kind: input, shape index: {}]   ;;  %s3367_s1 = inlined_call_operand.vmem [shape: f32[16,8], index: 1, kind: input, shape index: {}]   ;;  %s3368_s2 = inlined_call_operand.vmem [shape: f32[6,2,32], index: 2, kind: input, shape index: {}]   ;;  %s3369_s3 = inlined_call_operand.hbm [shape: f32[336,128], index: 3, kind: input, shape index: {}]   ;;  %s3370_s4 = inlined_call_operand.vmem [shape: f32[8,128], index: 4, kind: input, shape index: {}]   ;;  %s3371_s5 = inlined_call_operand.vmem [shape: f32[12,128], index: 5, kind: output, shape index: {}]  }
   0x1   :  { %s22_s19 = sshll.u32 %s2965_s18, 4  ;;  %s2941_s22 = scalar_lea.hbm %s3369_s3, 5376  ;;  %s23_s19 = int_to_ptr.vmem [resolvable:$true] %s22_s19 }
   0x2   :  { %p2942_p0 = scmp.ne.s32.totalorder %s3369_s3, %s2941_s22  ;;  %p2945_p1 = scmp.lt.u32.totalorder %s2941_s22, %s3369_s3 }
   0x4   :  { %p2947_p2 = pnand %p2945_p1, %p2942_p0 }
   0x6   :  { %2950 = shalt.err (!%p2947_p2)
}
   0x7   :  { %s2951_s27 = scalar_lea.vmem %s23_s19, 5376  ;;  %p2956_p4 = scmp.lt.s32.totalorder %s23_s19, %s23_s19 }
   0x8   :  { %p2952_p3 = scmp.ne.s32.totalorder %s23_s19, %s2951_s27  ;;  %p2957_p5 = scmp.lt.s32.totalorder %s2951_s27, %s2951_s27 }
   0xa   :  { %p2958_p6 = por %p2957_p5, %p2956_p4 }
   0xc   :  { %p2959_p7 = pnand %p2958_p6, %p2952_p3 }
   0xe   :  { %2962 = shalt.err (!%p2959_p7)
}
   0xf   :  { %s2966_s28 = smov 128   ;;  %s2967_s29 = smov 8  }
  0x10   :  { %28 = dma.hbm_to_vmem [thread:$0]  %s3369_s3, 5376, %s23_s19, [#allocation3], %s2966_s28, %s2966_s28, %s2967_s29  }
  0x11   :  { %2963 = dma.done.wait [#allocation3], 5376  }
  0x12   :  { %2964 = vsyncadd [#allocation3], 4294961920  ;;  %v2968_v0 = vmov 0.0   ;;  %vm2969_vm0 = vmmov 0   ;;  %v2970_v1 = vmov 0.0|0.0   ;;  %vm86_vm1 = vcmask 64512  }
  0x13   :  { %2415 = vmatprep.subr.mxu0 %v2968_v0  ;;  %2417 = vmatprep.mubr.msk.f32.mxu0 %vm2969_vm0, %v2968_v0  ;;  %v34_v2 = vld [vmem:[#allocation2] sm:$0xff]  ;;  %v44_v4 = vld [vmem:[#allocation2 + $0x50] sm:$0xff]  ;;  %v45_v5 = vld [vmem:[#allocation2 + $0x58] sm:$0xff]  ;;  %vm163_vm2 = vcmask 261120   ;;  %s2971_s11 = smov 64   ;;  %s2972_s14 = smov 32  }
  0x14   :  { %2678 = vmatprep.subr.bf16.mxu1 %v2970_v1  ;;  %2450 = vmatprep.mubr.msk.f32.mxu1 %vm2969_vm0, %v2968_v0  ;;  %v81_v3 = vld [vmem:[%s3366_s0] sm:$0xff]  ;;  %v47_v7 = vld [vmem:[#allocation2 + $0x68] sm:$0xff]  ;;  %v2667_v8 = vpack.c.bf16 %v45_v5, %v44_v4  ;;  %vm1523_vm3 = vcmask 1041408   ;;  %vm1525_vm4 = vcmask 1043456   ;;  %vm1527_vm5 = vcmask 1045504   ;;  %s2973_s29 = smov 96  }
  0x15   :  { %2416 = vmatpush3.msra.mxu0 %v34_v2  ;;  %v46_v6 = vld [vmem:[#allocation2 + $0x60] sm:$0xff]  ;;  %vm1545_vm6 = vcmask 523264   ;;  %vm2058_vm7 = vcmask 1040384   ;;  %vm2061_vm8 = vcmask 1042432   ;;  %vm2064_vm9 = vcmask 1044480  }
  0x16   :  { %2418 = vmatmul.mubr.msk.f32.vlgmr.msra.gmra.mrb[0].mxu0 %vm86_vm1, %v81_v3  ;;  %2666 = vmatprep.subr.bf16.mxu0 %v2970_v1  ;;  %v2670_v9 = vpack.c.bf16 %v47_v7, %v46_v6  ;;  %v160_v10 = vld [vmem:[%s3368_s2] sm:$0x3]  ;;  %v2254_v19 = vld [vmem:[%s3368_s2 + $0x2] sm:$0x3]  ;;  %v35_v7 = vld [vmem:[#allocation2 + $0x8] sm:$0xff]  ;;  %vm2067_vm10 = vcmask 1046528  }
  0x17   :  { %2428 = vmatprep.mubr.msk.f32.mxu0 %vm2969_vm0, %v2968_v0  ;;  %2668 = vmatpush3.bf16.msra.mxu0 %v2667_v8  ;;  %v2252_v13 = vld [vmem:[%s3370_s4] ss:$0 sm:$0xff]  ;;  %vm2238_vm11 = vcmask 785408  }
  0x18   :  { %2680 = vmatpush3.bf16.msra.mxu1 %v2667_v8  ;;  %2669 = vmatprep.subr.bf16.mxu0 %v2970_v1 }
  0x19   :  { %2681 = vmatprep.subr.bf16.mxu1 %v2970_v1 }
  0x1b   :  { %2671 = vmatpush3.bf16.msra.mxu0 %v2670_v9 }
  0x1c   :  { %2683 = vmatpush3.bf16.msra.mxu1 %v2670_v9  ;;  %2672 = vmatprep.subr.bf16.mxu0 %v2970_v1 }
  0x1d   :  { %2696 = vmatprep.subr.bf16.mxu1 %v2970_v1 }
  0x1e   :  { %2429 = vmatmul.mubr.msk.f32.vlgmr.msra.gmra.mrb[2].mxu0 %vm163_vm2, %v160_v10  ;;  %v49_v10 = vld [vmem:[#allocation2 + $0x78] sm:$0xff] }
  0x1f   :  { %2674 = vmatpush3.bf16.msra.mxu0 %v2667_v8  ;;  %2439 = vmatprep.mubr.msk.f32.mxu0 %vm2969_vm0, %v2968_v0 }
  0x20   :  { %2675 = vmatprep.subr.bf16.mxu0 %v2970_v1 }
  0x23   :  { %2677 = vmatpush3.bf16.msra.mxu0 %v2670_v9 }
  0x24   :  { %2684 = vmatprep.subr.bf16.mxu0 %v2970_v1 }
  0xe9   :  { %v156_v11 = vpop.f32.mrb[0].mxu0 }
  0xea   :  { %v2419_v12 = vpop.f32.mrb[1].mxu0  ;;  %v3044_v14 = vadd.f32 %v2252_v13, %v156_v11  ;;  %v51_v13 = vld [vmem:[#allocation2 + $0x88] sm:$0xff] }
  0xeb   :  { %v50_v12 = vld [vmem:[#allocation2 + $0x80] sm:$0xff] }
  0xf1   :  { %v233_v15 = vpop.f32.mrb[2].mxu0 }
  0xf2   :  { %v237_v16 = vadd.f32 %v233_v15, %v3044_v14  ;;  %v2430_v17 = vpop.f32.mrb[3].mxu0  ;;  %v3081_v15 = vpack.c.bf16 %v51_v13, %v50_v12 }
  0xf4   :  { %2813 = vtanh.f32 %v237_v16  ;;  %v2256_v20 = vmul.f32 -1.442695, %v237_v16 }
  0xf6   :  { %2815 = vpow2.f32 %v2256_v20 }
  0xfe   :  { %v2814_v18 = vpop.eup %2813 }
  0xff   :  { %251 = vrot.lane.b32.xlu0 %v2814_v18, %s2971_s11 }
 0x100   :  { %v2816_v21 = vpop.eup %2815 }
 0x101   :  { %v241_v22 = vadd.f32 1.0, %v2816_v21  ;;  %v2267_v21 = vld [vmem:[%s3368_s2 + $0x6] sm:$0x3] }
 0x103   :  { %246 = vrot.lane.b32.xlu0 %v2254_v19, %s2972_s14  ;;  %2817 = vrcp.f32 %v241_v22  ;;  %v586_v22 = vld [vmem:[%s3367_s1] sm:$0xff] }
 0x10d   :  { %v2818_v23 = vpop.eup %2817 }
 0x171   :  { %v252_v24 = vpop.permute.xlu0 %251 }
 0x172   :  { %v254_v25 = vmul.f32 %v2818_v23, %v252_v24  ;;  %v587_v24 = vld [vmem:[%s3367_s1 + $0x8] sm:$0xff] }
 0x174   :  { %256 = vrot.lane.b32.xlu1 %v254_v25, %s2972_s14  ;;  %v2266_v25 = vld [vmem:[%s3368_s2 + $0x4] sm:$0x3] }
 0x175   :  { %v247_v26 = vpop.permute.xlu0 %246 }
 0x176   :  { %v249_v27 = vmul.f32 %v2818_v23, %v247_v26 }
 0x1e6   :  { %v257_v28 = vpop.permute.xlu1 %256 }
 0x1e7   :  { %v259_v29 = vadd.f32 %v257_v28, %v249_v27  ;;  %v2263_v28 = vld [vmem:[%s3370_s4 + $0x1] ss:$0 sm:$0xff] }
 0x1e9   :  { %2819 = vtanh.f32 %v259_v29  ;;  %v353_v45 = vrot.slane %v259_v29, 6 }
 0x1f3   :  { %v2820_v30 = vpop.eup %2819 }
 0x1f4   :  { %262 = vrot.lane.b32.xlu1 %v2820_v30, %s2971_s11 }
 0x266   :  { %v263_v31 = vpop.permute.xlu1 %262 }
 0x267   :  { %v3054_v32 = vmul.f32 %v2818_v23, %v263_v31 }
 0x269   :  { %267 = vrot.lane.b32.xlu0 %v3054_v32, %s2972_s14 }
 0x2db   :  { %v268_v33 = vpop.permute.xlu0 %267 }
 0x2dc   :  { %2440 = vmatmul.mubr.msk.f32.vlgmr.msra.gmra.mrb[4].mxu0 %vm163_vm2, %v268_v33 }
 0x2dd   :  { %2686 = vmatpush3.bf16.msra.mxu0 %v2667_v8  ;;  %2461 = vmatprep.mubr.msk.f32.mxu0 %vm2969_vm0, %v2968_v0 }
 0x2de   :  { %2687 = vmatprep.subr.bf16.mxu0 %v2970_v1 }
 0x2e1   :  { %2689 = vmatpush3.bf16.msra.mxu0 %v2670_v9  ;;  %v48_v9 = vld [vmem:[#allocation2 + $0x70] sm:$0xff] }
 0x2e2   :  { %2464 = vmatprep.subr.mxu0 %v35_v7  ;;  %v3077_v11 = vpack.c.bf16 %v49_v10, %v48_v9 }
 0x3af   :  { %v337_v34 = vpop.f32.mrb[4].mxu0 }
 0x3b0   :  { %v342_v35 = vrot.slane %v337_v34, 6  ;;  %v2441_v36 = vpop.f32.mrb[5].mxu0 }
 0x3b2   :  { %v344_v37 = vadd.f32 %v342_v35, %v3044_v14 }
 0x3b4   :  { %2821 = vtanh.f32 %v344_v37  ;;  %v2258_v39 = vmul.f32 -1.442695, %v344_v37 }
 0x3b6   :  { %2823 = vpow2.f32 %v2258_v39 }
 0x3be   :  { %v2822_v38 = vpop.eup %2821 }
 0x3bf   :  { %357 = vrot.lane.b32.xlu1 %v2822_v38, %s2971_s11 }
 0x3c0   :  { %v2824_v40 = vpop.eup %2823 }
 0x3c1   :  { %v348_v41 = vadd.f32 1.0, %v2824_v40 }
 0x3c3   :  { %2825 = vrcp.f32 %v348_v41 }
 0x3cd   :  { %v2826_v42 = vpop.eup %2825 }
 0x3ce   :  { %v355_v46 = vmul.f32 %v2826_v42, %v353_v45 }
 0x431   :  { %v358_v43 = vpop.permute.xlu1 %357 }
 0x432   :  { %v360_v44 = vmul.f32 %v2826_v42, %v358_v43 }
 0x434   :  { %362 = vrot.lane.b32.xlu0 %v360_v44, %s2972_s14 }
 0x4a6   :  { %v363_v47 = vpop.permute.xlu0 %362 }
 0x4a7   :  { %v365_v48 = vadd.f32 %v363_v47, %v355_v46 }
 0x4a9   :  { %2827 = vtanh.f32 %v365_v48  ;;  %v460_v3 = vrot.slane %v365_v48, 6 }
 0x4b3   :  { %v2828_v49 = vpop.eup %2827 }
 0x4b4   :  { %368 = vrot.lane.b32.xlu1 %v2828_v49, %s2971_s11 }
 0x526   :  { %v369_v50 = vpop.permute.xlu1 %368 }
 0x527   :  { %v371_v51 = vmul.f32 %v2826_v42, %v369_v50 }
 0x529   :  { %v373_v52 = vrot.slane %v371_v51, 2  ;;  %v1524_v18 = vsel %vm1523_vm3, %v3054_v32, %v371_v51 }
 0x52b   :  { %374 = vrot.lane.b32.xlu0 %v373_v52, %s2972_s14 }
 0x59d   :  { %v375_v53 = vpop.permute.xlu0 %374 }
 0x59e   :  { %2451 = vmatmul.mubr.msk.f32.vlgmr.msra.gmra.mrb[0].mxu1 %vm163_vm2, %v375_v53 }
 0x59f   :  { %2488 = vmatprep.mubr.msk.f32.mxu1 %vm2969_vm0, %v2968_v0  ;;  %2698 = vmatpush3.bf16.msra.mxu1 %v3077_v11 }
 0x5a0   :  { %2699 = vmatprep.subr.bf16.mxu1 %v2970_v1 }
 0x5a3   :  { %2701 = vmatpush3.bf16.msra.mxu1 %v3081_v15 }
 0x5a4   :  { %2708 = vmatprep.subr.bf16.mxu1 %v2970_v1 }
 0x671   :  { %v444_v54 = vpop.f32.mrb[0].mxu1 }
 0x672   :  { %v449_v55 = vrot.slane %v444_v54, 4  ;;  %v2452_v56 = vpop.f32.mrb[1].mxu1 }
 0x674   :  { %v451_v57 = vadd.f32 %v449_v55, %v3044_v14 }
 0x676   :  { %2829 = vtanh.f32 %v451_v57  ;;  %v2260_v59 = vmul.f32 -1.442695, %v451_v57 }
 0x678   :  { %2831 = vpow2.f32 %v2260_v59 }
 0x680   :  { %v2830_v58 = vpop.eup %2829 }
 0x681   :  { %464 = vrot.lane.b32.xlu1 %v2830_v58, %s2971_s11 }
 0x682   :  { %v2832_v60 = vpop.eup %2831 }
 0x683   :  { %v455_v61 = vadd.f32 1.0, %v2832_v60 }
 0x685   :  { %2833 = vrcp.f32 %v455_v61 }
 0x68f   :  { %v2834_v62 = vpop.eup %2833 }
 0x690   :  { %v462_v4 = vmul.f32 %v2834_v62, %v460_v3 }
 0x6f3   :  { %v465_v63 = vpop.permute.xlu1 %464 }
 0x6f4   :  { %v467_v2 = vmul.f32 %v2834_v62, %v465_v63 }
 0x6f6   :  { %469 = vrot.lane.b32.xlu0 %v467_v2, %s2972_s14 }
 0x768   :  { %v470_v5 = vpop.permute.xlu0 %469 }
 0x769   :  { %v3073_v6 = vadd.f32 %v470_v5, %v462_v4 }
 0x76b   :  { %2835 = vtanh.f32 %v3073_v6 }
 0x775   :  { %v2836_v8 = vpop.eup %2835 }
 0x776   :  { %475 = vrot.lane.b32.xlu1 %v2836_v8, %s2971_s11 }
 0x7e8   :  { %v476_v16 = vpop.permute.xlu1 %475 }
 0x7e9   :  { %v478_v17 = vmul.f32 %v2834_v62, %v476_v16 }
 0x7eb   :  { %v480_v19 = vrot.slane %v478_v17, 4  ;;  %v3088_v20 = vsel %vm1525_vm4, %v1524_v18, %v478_v17 }
 0x7ed   :  { %481 = vrot.lane.b32.xlu0 %v480_v19, %s2972_s14 }
 0x7f1   :  { %759 = vrot.lane.b32.xlu0 %v2267_v21, %s2972_s14 }
 0x85f   :  { %v482_v23 = vpop.permute.xlu0 %481 }
 0x860   :  { %2462 = vmatmul.mubr.msk.f32.vlgmr.msra.gmra.mrb[6].mxu0 %vm163_vm2, %v482_v23 }
 0x861   :  { %2465 = vmatpush3.msra.mxu0 %v35_v7  ;;  %2466 = vmatprep.mubr.msk.f32.mxu0 %vm86_vm1, %v586_v22 }
 0x862   :  { %2690 = vmatprep.subr.bf16.mxu0 %v2970_v1 }
 0x863   :  { %v760_v43 = vpop.permute.xlu0 %759 }
 0x864   :  { %2467 = vmatmul.mubr.msk.f32.vlgmr.msra.gmra.mrb[8].mxu0 %vm86_vm1, %v587_v24 }
 0x865   :  { %2692 = vmatpush3.bf16.msra.mxu0 %v3077_v11  ;;  %2477 = vmatprep.mubr.msk.f32.mxu0 %vm2969_vm0, %v2968_v0 }
 0x866   :  { %2693 = vmatprep.subr.bf16.mxu0 %v2970_v1 }
 0x869   :  { %2695 = vmatpush3.bf16.msra.mxu0 %v3081_v15 }
 0x86a   :  { %2702 = vmatprep.subr.bf16.mxu0 %v2970_v1 }
 0x86c   :  { %2478 = vmatmul.mubr.msk.f32.vlgmr.msra.gmra.mrb[10].mxu0 %vm163_vm2, %v2266_v25 }
 0x86d   :  { %2704 = vmatpush3.bf16.msra.mxu0 %v3077_v11  ;;  %2499 = vmatprep.mubr.msk.f32.mxu0 %vm2969_vm0, %v2968_v0 }
 0x86e   :  { %2705 = vmatprep.subr.bf16.mxu0 %v2970_v1 }
 0x871   :  { %2707 = vmatpush3.bf16.msra.mxu0 %v3081_v15 }
 0x872   :  { %2714 = vmatprep.subr.bf16.mxu0 %v2970_v1 }
 0x933   :  { %v3121_v26 = vpop.f32.mrb[6].mxu0 }
 0x934   :  { %v2463_v27 = vpop.f32.mrb[7].mxu0 }
 0x937   :  { %v2468_v29 = vpop.f32.mrb[8].mxu0 }
 0x938   :  { %v3126_v30 = vadd.f32 %v2468_v29, %v2263_v28  ;;  %v664_v31 = vpop.f32.mrb[9].mxu0 }
 0x939   :  { %v3128_v32 = vadd.f32 %v2263_v28, %v664_v31 }
 0x93f   :  { %v746_v33 = vpop.f32.mrb[10].mxu0 }
 0x940   :  { %v750_v34 = vadd.f32 %v746_v33, %v3128_v32  ;;  %v2479_v35 = vpop.f32.mrb[11].mxu0 }
 0x942   :  { %2837 = vtanh.f32 %v750_v34  ;;  %v2269_v37 = vmul.f32 -1.442695, %v750_v34 }
 0x944   :  { %2839 = vpow2.f32 %v2269_v37 }
 0x94c   :  { %v2838_v36 = vpop.eup %2837 }
 0x94d   :  { %764 = vrot.lane.b32.xlu1 %v2838_v36, %s2971_s11 }
 0x94e   :  { %v2840_v38 = vpop.eup %2839 }
 0x94f   :  { %v754_v39 = vadd.f32 1.0, %v2840_v38 }
 0x951   :  { %2841 = vrcp.f32 %v754_v39 }
 0x95b   :  { %v2842_v40 = vpop.eup %2841 }
 0x95c   :  { %v762_v44 = vmul.f32 %v2842_v40, %v760_v43 }
 0x9bf   :  { %v765_v41 = vpop.permute.xlu1 %764 }
 0x9c0   :  { %v767_v42 = vmul.f32 %v2842_v40, %v765_v41 }
 0x9c2   :  { %769 = vrot.lane.b32.xlu1 %v767_v42, %s2972_s14 }
 0xa34   :  { %v770_v45 = vpop.permute.xlu1 %769 }
 0xa35   :  { %v772_v46 = vadd.f32 %v770_v45, %v762_v44 }
 0xa37   :  { %2843 = vtanh.f32 %v772_v46  ;;  %v866_v62 = vrot.slane %v772_v46, 6 }
 0xa41   :  { %v2844_v47 = vpop.eup %2843 }
 0xa42   :  { %775 = vrot.lane.b32.xlu0 %v2844_v47, %s2971_s11 }
 0xab4   :  { %v776_v48 = vpop.permute.xlu0 %775 }
 0xab5   :  { %v778_v49 = vmul.f32 %v2842_v40, %v776_v48 }
 0xab7   :  { %780 = vrot.lane.b32.xlu1 %v778_v49, %s2972_s14 }
 0xb29   :  { %v781_v50 = vpop.permute.xlu1 %780 }
 0xb2a   :  { %2489 = vmatmul.mubr.msk.f32.vlgmr.msra.gmra.mrb[2].mxu1 %vm163_vm2, %v781_v50 }
 0xb2b   :  { %2710 = vmatpush3.bf16.msra.mxu1 %v3077_v11  ;;  %2510 = vmatprep.mubr.msk.f32.mxu1 %vm2969_vm0, %v2968_v0 }
 0xb2c   :  { %2711 = vmatprep.subr.bf16.mxu1 %v2970_v1 }
 0xb2f   :  { %2713 = vmatpush3.bf16.msra.mxu1 %v3081_v15 }
 0xb30   :  { %2720 = vmatprep.subr.bf16.mxu1 %v2970_v1 }
 0xbfd   :  { %v850_v51 = vpop.f32.mrb[2].mxu1 }
 0xbfe   :  { %v855_v52 = vrot.slane %v850_v51, 6  ;;  %v2490_v53 = vpop.f32.mrb[3].mxu1 }
 0xc00   :  { %v857_v54 = vadd.f32 %v855_v52, %v3128_v32 }
 0xc02   :  { %2845 = vtanh.f32 %v857_v54  ;;  %v2271_v56 = vmul.f32 -1.442695, %v857_v54 }
 0xc04   :  { %2847 = vpow2.f32 %v2271_v56 }
 0xc0c   :  { %v2846_v55 = vpop.eup %2845 }
 0xc0d   :  { %870 = vrot.lane.b32.xlu0 %v2846_v55, %s2971_s11 }
 0xc0e   :  { %v2848_v57 = vpop.eup %2847 }
 0xc0f   :  { %v861_v58 = vadd.f32 1.0, %v2848_v57 }
 0xc11   :  { %2849 = vrcp.f32 %v861_v58 }
 0xc1b   :  { %v2850_v59 = vpop.eup %2849 }
 0xc1c   :  { %v868_v63 = vmul.f32 %v2850_v59, %v866_v62 }
 0xc7f   :  { %v871_v60 = vpop.permute.xlu0 %870 }
 0xc80   :  { %v873_v61 = vmul.f32 %v2850_v59, %v871_v60 }
 0xc82   :  { %875 = vrot.lane.b32.xlu1 %v873_v61, %s2972_s14 }
 0xcf4   :  { %v876_v2 = vpop.permute.xlu1 %875 }
 0xcf5   :  { %v878_v3 = vadd.f32 %v876_v2, %v868_v63 }
 0xcf7   :  { %2851 = vtanh.f32 %v878_v3  ;;  %v973_v25 = vrot.slane %v878_v3, 6 }
 0xd01   :  { %v2852_v4 = vpop.eup %2851 }
 0xd02   :  { %881 = vrot.lane.b32.xlu0 %v2852_v4, %s2971_s11 }
 0xd74   :  { %v882_v5 = vpop.permute.xlu0 %881 }
 0xd75   :  { %v884_v7 = vmul.f32 %v2850_v59, %v882_v5 }
 0xd77   :  { %v886_v8 = vrot.slane %v884_v7, 2 }
 0xd79   :  { %887 = vrot.lane.b32.xlu1 %v886_v8, %s2972_s14 }
 0xdeb   :  { %v888_v9 = vpop.permute.xlu1 %887 }
 0xdec   :  { %2500 = vmatmul.mubr.msk.f32.vlgmr.msra.gmra.mrb[12].mxu0 %vm163_vm2, %v888_v9 }
 0xded   :  { %2716 = vmatpush3.bf16.msra.mxu0 %v3077_v11  ;;  %2521 = vmatprep.mubr.msk.f32.mxu0 %vm2969_vm0, %v2968_v0 }
 0xdee   :  { %2717 = vmatprep.subr.bf16.mxu0 %v2970_v1 }
 0xdf1   :  { %2719 = vmatpush3.bf16.msra.mxu0 %v3081_v15 }
 0xdf2   :  { %2726 = vmatprep.subr.bf16.mxu0 %v2970_v1 }
 0xebf   :  { %v957_v10 = vpop.f32.mrb[12].mxu0 }
 0xec0   :  { %v962_v12 = vrot.slane %v957_v10, 4  ;;  %v2501_v13 = vpop.f32.mrb[13].mxu0 }
 0xec2   :  { %v964_v16 = vadd.f32 %v962_v12, %v3128_v32 }
 0xec4   :  { %2853 = vtanh.f32 %v964_v16  ;;  %v2273_v18 = vmul.f32 -1.442695, %v964_v16 }
 0xec6   :  { %2855 = vpow2.f32 %v2273_v18 }
 0xece   :  { %v2854_v17 = vpop.eup %2853 }
 0xecf   :  { %977 = vrot.lane.b32.xlu0 %v2854_v17, %s2971_s11 }
 0xed0   :  { %v2856_v19 = vpop.eup %2855 }
 0xed1   :  { %v968_v21 = vadd.f32 1.0, %v2856_v19 }
 0xed3   :  { %2857 = vrcp.f32 %v968_v21 }
 0xedd   :  { %v2858_v22 = vpop.eup %2857 }
 0xede   :  { %v975_v27 = vmul.f32 %v2858_v22, %v973_v25 }
 0xf41   :  { %v978_v23 = vpop.permute.xlu0 %977 }
 0xf42   :  { %v980_v24 = vmul.f32 %v2858_v22, %v978_v23 }
 0xf44   :  { %982 = vrot.lane.b32.xlu1 %v980_v24, %s2972_s14 }
 0xfb6   :  { %v983_v28 = vpop.permute.xlu1 %982 }
 0xfb7   :  { %v985_v29 = vadd.f32 %v983_v28, %v975_v27 }
 0xfb9   :  { %2859 = vtanh.f32 %v985_v29  ;;  %v1080_v48 = vrot.slane %v985_v29, 6 }
 0xfc3   :  { %v2860_v31 = vpop.eup %2859 }
 0xfc4   :  { %988 = vrot.lane.b32.xlu0 %v2860_v31, %s2971_s11 }
0x1036   :  { %v989_v33 = vpop.permute.xlu0 %988 }
0x1037   :  { %v991_v34 = vmul.f32 %v2858_v22, %v989_v33 }
0x1039   :  { %v993_v35 = vrot.slane %v991_v34, 4 }
0x103b   :  { %994 = vrot.lane.b32.xlu1 %v993_v35, %s2972_s14 }
0x10ad   :  { %v995_v36 = vpop.permute.xlu1 %994 }
0x10ae   :  { %2511 = vmatmul.mubr.msk.f32.vlgmr.msra.gmra.mrb[4].mxu1 %vm163_vm2, %v995_v36 }
0x10af   :  { %2722 = vmatpush3.bf16.msra.mxu1 %v3077_v11  ;;  %2532 = vmatprep.mubr.msk.f32.mxu1 %vm2969_vm0, %v2968_v0 }
0x10b0   :  { %2723 = vmatprep.subr.bf16.mxu1 %v2970_v1 }
0x10b3   :  { %2725 = vmatpush3.bf16.msra.mxu1 %v3081_v15 }
0x10b4   :  { %2732 = vmatprep.subr.bf16.mxu1 %v2970_v1 }
0x1181   :  { %v1064_v37 = vpop.f32.mrb[4].mxu1 }
0x1182   :  { %v1069_v38 = vrot.slane %v1064_v37, 2  ;;  %v2512_v39 = vpop.f32.mrb[5].mxu1 }
0x1184   :  { %v1071_v40 = vadd.f32 %v1069_v38, %v3128_v32 }
0x1186   :  { %2861 = vtanh.f32 %v1071_v40  ;;  %v2275_v42 = vmul.f32 -1.442695, %v1071_v40 }
0x1188   :  { %2863 = vpow2.f32 %v2275_v42 }
0x1190   :  { %v2862_v41 = vpop.eup %2861 }
0x1191   :  { %1084 = vrot.lane.b32.xlu0 %v2862_v41, %s2971_s11 }
0x1192   :  { %v2864_v43 = vpop.eup %2863 }
0x1193   :  { %v1075_v44 = vadd.f32 1.0, %v2864_v43 }
0x1195   :  { %2865 = vrcp.f32 %v1075_v44 }
0x119f   :  { %v2866_v45 = vpop.eup %2865 }
0x11a0   :  { %v1082_v49 = vmul.f32 %v2866_v45, %v1080_v48 }
0x1203   :  { %v1085_v46 = vpop.permute.xlu0 %1084 }
0x1204   :  { %v1087_v47 = vmul.f32 %v2866_v45, %v1085_v46 }
0x1206   :  { %1089 = vrot.lane.b32.xlu1 %v1087_v47, %s2972_s14 }
0x1278   :  { %v1090_v50 = vpop.permute.xlu1 %1089 }
0x1279   :  { %v1092_v51 = vadd.f32 %v1090_v50, %v1082_v49  ;;  %v556_v50 = vrot.slane %v3121_v26, 2 }
0x127b   :  { %2867 = vtanh.f32 %v1092_v51  ;;  %v1184_v4 = vrot.slane %v1092_v51, 6 }
0x1285   :  { %v2868_v32 = vpop.eup %2867 }
0x1286   :  { %1095 = vrot.lane.b32.xlu0 %v2868_v32, %s2971_s11 }
0x12f8   :  { %v1096_v52 = vpop.permute.xlu0 %1095 }
0x12f9   :  { %v1098_v53 = vmul.f32 %v2866_v45, %v1096_v52 }
0x12fb   :  { %v1100_v54 = vrot.slane %v1098_v53, 6  ;;  %v558_v53 = vadd.f32 %v556_v50, %v3044_v14 }
0x12fd   :  { %1101 = vrot.lane.b32.xlu1 %v1100_v54, %s2972_s14 }
0x136f   :  { %v1102_v55 = vpop.permute.xlu1 %1101 }
0x1370   :  { %2522 = vmatmul.mubr.msk.f32.vlgmr.msra.gmra.mrb[14].mxu0 %vm163_vm2, %v1102_v55 }
0x1371   :  { %2728 = vmatpush3.bf16.msra.mxu0 %v3077_v11  ;;  %2543 = vmatprep.mubr.msk.f32.mxu0 %vm2969_vm0, %v2968_v0 }
0x1372   :  { %2729 = vmatprep.subr.bf16.mxu0 %v2970_v1 }
0x1375   :  { %2731 = vmatpush3.bf16.msra.mxu0 %v3081_v15 }
0x1376   :  { %2738 = vmatprep.subr.bf16.mxu0 %v2970_v1 }
0x1443   :  { %v1171_v56 = vpop.f32.mrb[14].mxu0 }
0x1444   :  { %v1175_v57 = vadd.f32 %v1171_v56, %v3126_v30  ;;  %v2523_v58 = vpop.f32.mrb[15].mxu0  ;;  %v2262_v56 = vmul.f32 -1.442695, %v558_v53 }
0x1446   :  { %2869 = vtanh.f32 %v1175_v57  ;;  %v2277_v60 = vmul.f32 -1.442695, %v1175_v57 }
0x1448   :  { %2871 = vpow2.f32 %v2277_v60 }
0x1450   :  { %v2870_v59 = vpop.eup %2869 }
0x1451   :  { %1188 = vrot.lane.b32.xlu0 %v2870_v59, %s2971_s11 }
0x1452   :  { %v2872_v61 = vpop.eup %2871 }
0x1453   :  { %v1179_v62 = vadd.f32 1.0, %v2872_v61 }
0x1455   :  { %2873 = vrcp.f32 %v1179_v62 }
0x145f   :  { %v2874_v63 = vpop.eup %2873 }
0x1460   :  { %v1186_v5 = vmul.f32 %v2874_v63, %v1184_v4 }
0x14c3   :  { %v1189_v2 = vpop.permute.xlu0 %1188 }
0x14c4   :  { %v1191_v3 = vmul.f32 %v2874_v63, %v1189_v2 }
0x14c6   :  { %1193 = vrot.lane.b32.xlu1 %v1191_v3, %s2972_s14  ;;  %v567_v3 = vrot.slane %v3073_v6, 6 }
0x1538   :  { %v1194_v7 = vpop.permute.xlu1 %1193 }
0x1539   :  { %v1196_v8 = vadd.f32 %v1194_v7, %v1186_v5 }
0x153b   :  { %2875 = vtanh.f32 %v1196_v8 }
0x1545   :  { %v2876_v9 = vpop.eup %2875 }
0x1546   :  { %1199 = vrot.lane.b32.xlu0 %v2876_v9, %s2971_s11 }
0x15b8   :  { %v1200_v10 = vpop.permute.xlu0 %1199 }
0x15b9   :  { %v3182_v12 = vmul.f32 %v2874_v63, %v1200_v10 }
0x15bb   :  { %1204 = vrot.lane.b32.xlu1 %v3182_v12, %s2972_s14 }
0x162d   :  { %v1205_v13 = vpop.permute.xlu1 %1204 }
0x162e   :  { %2533 = vmatmul.mubr.msk.f32.vlgmr.msra.gmra.mrb[6].mxu1 %vm163_vm2, %v1205_v13 }
0x162f   :  { %2734 = vmatpush3.bf16.msra.mxu1 %v3077_v11  ;;  %2554 = vmatprep.mubr.msk.f32.mxu1 %vm2969_vm0, %v2968_v0 }
0x1630   :  { %2735 = vmatprep.subr.bf16.mxu1 %v2970_v1 }
0x1633   :  { %2737 = vmatpush3.bf16.msra.mxu1 %v3081_v15  ;;  %v1290_v15 = vrot.slane %v1196_v8, 6 }
0x1634   :  { %2750 = vmatprep.subr.bf16.mxu1 %v2970_v1 }
0x1701   :  { %v1274_v16 = vpop.f32.mrb[6].mxu1 }
0x1702   :  { %v1279_v17 = vrot.slane %v1274_v16, 6  ;;  %v2534_v18 = vpop.f32.mrb[7].mxu1 }
0x1704   :  { %v1281_v19 = vadd.f32 %v1279_v17, %v3126_v30 }
0x1706   :  { %2877 = vtanh.f32 %v1281_v19  ;;  %v2279_v22 = vmul.f32 -1.442695, %v1281_v19 }
0x1708   :  { %2879 = vpow2.f32 %v2279_v22 }
0x1710   :  { %v2878_v21 = vpop.eup %2877 }
0x1711   :  { %1294 = vrot.lane.b32.xlu0 %v2878_v21, %s2971_s11 }
0x1712   :  { %v2880_v11 = vpop.eup %2879 }
0x1713   :  { %v1285_v23 = vadd.f32 1.0, %v2880_v11 }
0x1715   :  { %2881 = vrcp.f32 %v1285_v23 }
0x171f   :  { %v2882_v24 = vpop.eup %2881 }
0x1720   :  { %v1292_v28 = vmul.f32 %v2882_v24, %v1290_v15 }
0x1783   :  { %v1295_v25 = vpop.permute.xlu0 %1294 }
0x1784   :  { %v1297_v27 = vmul.f32 %v2882_v24, %v1295_v25 }
0x1786   :  { %1299 = vrot.lane.b32.xlu1 %v1297_v27, %s2972_s14 }
0x17f8   :  { %v1300_v29 = vpop.permute.xlu1 %1299 }
0x17f9   :  { %v1302_v31 = vadd.f32 %v1300_v29, %v1292_v28  ;;  %v37_v29 = vld [vmem:[#allocation2 + $0x18] sm:$0xff] }
0x17fb   :  { %2883 = vtanh.f32 %v1302_v31  ;;  %v1397_v49 = vrot.slane %v1302_v31, 6  ;;  %v38_v31 = vld [vmem:[#allocation2 + $0x20] sm:$0xff] }
0x1805   :  { %v2884_v33 = vpop.eup %2883 }
0x1806   :  { %1305 = vrot.lane.b32.xlu0 %v2884_v33, %s2971_s11 }
0x1878   :  { %v1306_v34 = vpop.permute.xlu0 %1305 }
0x1879   :  { %v1308_v35 = vmul.f32 %v2882_v24, %v1306_v34  ;;  %v39_v34 = vld [vmem:[#allocation2 + $0x28] sm:$0xff] }
0x187b   :  { %v1310_v36 = vrot.slane %v1308_v35, 2  ;;  %v1529_v60 = vsel %vm1523_vm3, %v3182_v12, %v1308_v35  ;;  %v52_v35 = vld [vmem:[#allocation2 + $0x90] sm:$0xff] }
0x187d   :  { %1311 = vrot.lane.b32.xlu1 %v1310_v36, %s2972_s14  ;;  %v53_v36 = vld [vmem:[#allocation2 + $0x98] sm:$0xff] }
0x18ef   :  { %v1312_v37 = vpop.permute.xlu1 %1311 }
0x18f0   :  { %2544 = vmatmul.mubr.msk.f32.vlgmr.msra.gmra.mrb[16].mxu0 %vm163_vm2, %v1312_v37  ;;  %v2742_v37 = vpack.c.bf16 %v39_v34, %v38_v31 }
0x18f1   :  { %2573 = vmatprep.mubr.msk.f32.mxu0 %vm2969_vm0, %v2968_v0 }
0x19c3   :  { %v1381_v38 = vpop.f32.mrb[16].mxu0 }
0x19c4   :  { %v1386_v39 = vrot.slane %v1381_v38, 4  ;;  %v2545_v40 = vpop.f32.mrb[17].mxu0  ;;  %v3235_v38 = vpack.c.bf16 %v53_v36, %v52_v35 }
0x19c5   :  { %v55_v40 = vld [vmem:[#allocation2 + $0xa8] sm:$0xff] }
0x19c6   :  { %v1388_v41 = vadd.f32 %v1386_v39, %v3126_v30  ;;  %v54_v39 = vld [vmem:[#allocation2 + $0xa0] sm:$0xff] }
0x19c8   :  { %2885 = vtanh.f32 %v1388_v41  ;;  %v2281_v43 = vmul.f32 -1.442695, %v1388_v41  ;;  %v40_v41 = vld [vmem:[#allocation2 + $0x30] sm:$0xff] }
0x19ca   :  { %2887 = vpow2.f32 %v2281_v43  ;;  %v3239_v43 = vpack.c.bf16 %v55_v40, %v54_v39 }
0x19d2   :  { %v2886_v42 = vpop.eup %2885 }
0x19d3   :  { %1401 = vrot.lane.b32.xlu0 %v2886_v42, %s2971_s11  ;;  %v41_v42 = vld [vmem:[#allocation2 + $0x38] sm:$0xff] }
0x19d4   :  { %v2888_v44 = vpop.eup %2887 }
0x19d5   :  { %v1392_v45 = vadd.f32 1.0, %v2888_v44  ;;  %v2745_v44 = vpack.c.bf16 %v41_v42, %v40_v41 }
0x19d7   :  { %2889 = vrcp.f32 %v1392_v45  ;;  %v42_v45 = vld [vmem:[#allocation2 + $0x40] sm:$0xff] }
0x19e1   :  { %v2890_v46 = vpop.eup %2889 }
0x19e2   :  { %v1399_v51 = vmul.f32 %v2890_v46, %v1397_v49  ;;  %v2286_v49 = vld [vmem:[%s3368_s2 + $0x8] sm:$0x3] }
0x1a45   :  { %v1402_v47 = vpop.permute.xlu0 %1401 }
0x1a46   :  { %v1404_v48 = vmul.f32 %v2890_v46, %v1402_v47 }
0x1a48   :  { %1406 = vrot.lane.b32.xlu1 %v1404_v48, %s2972_s14 }
0x1aba   :  { %v1407_v32 = vpop.permute.xlu1 %1406 }
0x1abb   :  { %v1409_v52 = vadd.f32 %v1407_v32, %v1399_v51 }
0x1abd   :  { %2891 = vtanh.f32 %v1409_v52 }
0x1abe   :  { %2893 = vtanh.f32 %v558_v53 }
0x1abf   :  { %2895 = vpow2.f32 %v2262_v56 }
0x1ac7   :  { %v2892_v54 = vpop.eup %2891 }
0x1ac8   :  { %1412 = vrot.lane.b32.xlu0 %v2892_v54, %s2971_s11  ;;  %v2894_v55 = vpop.eup %2893 }
0x1ac9   :  { %v2896_v57 = vpop.eup %2895 }
0x1aca   :  { %v562_v58 = vadd.f32 1.0, %v2896_v57 }
0x1acc   :  { %571 = vrot.lane.b32.xlu0 %v2894_v55, %s2971_s11  ;;  %2897 = vrcp.f32 %v562_v58  ;;  %v2284_v58 = vld [vmem:[%s3370_s4 + $0x2] ss:$0 sm:$0xff] }
0x1ad6   :  { %v2898_v62 = vpop.eup %2897 }
0x1ad7   :  { %v569_v5 = vmul.f32 %v2898_v62, %v567_v3 }
0x1b3a   :  { %v1413_v59 = vpop.permute.xlu0 %1412 }
0x1b3b   :  { %v1415_v26 = vmul.f32 %v2890_v46, %v1413_v59  ;;  %v43_v46 = vld [vmem:[#allocation2 + $0x48] sm:$0xff] }
0x1b3c   :  { %v2748_v48 = vpack.c.bf16 %v43_v46, %v42_v45 }
0x1b3d   :  { %v1417_v61 = vrot.slane %v1415_v26, 4  ;;  %v3211_v14 = vsel %vm1525_vm4, %v1529_v60, %v1415_v26 }
0x1b3e   :  { %v572_v63 = vpop.permute.xlu0 %571 }
0x1b3f   :  { %v574_v2 = vmul.f32 %v2898_v62, %v572_v63  ;;  %1418 = vrot.lane.b32.xlu1 %v1417_v61, %s2972_s14 }
0x1b41   :  { %576 = vrot.lane.b32.xlu0 %v574_v2, %s2972_s14 }
0x1bb1   :  { %v1419_v4 = vpop.permute.xlu1 %1418 }
0x1bb2   :  { %2555 = vmatmul.mubr.msk.f32.vlgmr.msra.gmra.mrb[8].mxu1 %vm163_vm2, %v1419_v4 }
0x1bb3   :  { %v577_v7 = vpop.permute.xlu0 %576  ;;  %2584 = vmatprep.mubr.msk.f32.mxu1 %vm2969_vm0, %v2968_v0  ;;  %2752 = vmatpush3.bf16.msra.mxu1 %v3235_v38 }
0x1bb4   :  { %v3219_v8 = vadd.f32 %v577_v7, %v569_v5  ;;  %2753 = vmatprep.subr.bf16.mxu1 %v2970_v1 }
0x1bb6   :  { %2899 = vtanh.f32 %v3219_v8 }
0x1bb7   :  { %2755 = vmatpush3.bf16.msra.mxu1 %v3239_v43 }
0x1bb8   :  { %2756 = vmatprep.subr.bf16.mxu1 %v2970_v1 }
0x1bba   :  { %2585 = vmatmul.mubr.msk.f32.vlgmr.msra.gmra.mrb[10].mxu1 %vm163_vm2, %v2286_v49 }
0x1bbb   :  { %2758 = vmatpush3.bf16.msra.mxu1 %v3235_v38  ;;  %2595 = vmatprep.mubr.msk.f32.mxu1 %vm2969_vm0, %v2968_v0 }
0x1bbc   :  { %2759 = vmatprep.subr.bf16.mxu1 %v2970_v1 }
0x1bbf   :  { %2761 = vmatpush3.bf16.msra.mxu1 %v3239_v43 }
0x1bc0   :  { %v2900_v9 = vpop.eup %2899  ;;  %2768 = vmatprep.subr.bf16.mxu1 %v2970_v1 }
0x1bc1   :  { %582 = vrot.lane.b32.xlu0 %v2900_v9, %s2971_s11 }
0x1c33   :  { %v583_v10 = vpop.permute.xlu0 %582 }
0x1c34   :  { %v3223_v12 = vmul.f32 %v2898_v62, %v583_v10 }
0x1c36   :  { %v1528_v6 = vsel %vm1527_vm5, %v3088_v20, %v3223_v12  ;;  %v1504_v20 = vrot.slane %v1409_v52, 6  ;;  %v2287_v52 = vld [vmem:[%s3368_s2 + $0xa] sm:$0x3] }
0x1c37   :  { %1533 = vrot.lane.b32.xlu0 %v1528_v6, %s2972_s14 }
0x1c85   :  { %v1488_v13 = vpop.f32.mrb[8].mxu1 }
0x1c86   :  { %v1493_v16 = vrot.slane %v1488_v13, 2  ;;  %v2556_v17 = vpop.f32.mrb[9].mxu1 }
0x1c88   :  { %v1495_v18 = vadd.f32 %v1493_v16, %v3126_v30  ;;  %v36_v30 = vld [vmem:[#allocation2 + $0x10] sm:$0xff] }
0x1c89   :  { %v2739_v33 = vpack.c.bf16 %v37_v29, %v36_v30 }
0x1c8a   :  { %2901 = vtanh.f32 %v1495_v18  ;;  %v2283_v21 = vmul.f32 -1.442695, %v1495_v18 }
0x1c8b   :  { %2740 = vmatpush3.bf16.msra.mxu0 %v2739_v33 }
0x1c8c   :  { %2903 = vpow2.f32 %v2283_v21  ;;  %2741 = vmatprep.subr.bf16.mxu0 %v2970_v1 }
0x1c8d   :  { %v1692_v56 = vpop.f32.mrb[10].mxu1 }
0x1c8e   :  { %v2586_v57 = vpop.f32.mrb[11].mxu1 }
0x1c8f   :  { %2743 = vmatpush3.bf16.msra.mxu0 %v2742_v37 }
0x1c90   :  { %2744 = vmatprep.subr.bf16.mxu0 %v2970_v1 }
0x1c93   :  { %2746 = vmatpush3.bf16.msra.mxu0 %v2745_v44 }
0x1c94   :  { %v2902_v19 = vpop.eup %2901  ;;  %2747 = vmatprep.subr.bf16.mxu0 %v2970_v1 }
0x1c95   :  { %1508 = vrot.lane.b32.xlu1 %v2902_v19, %s2971_s11 }
0x1c96   :  { %v2904_v22 = vpop.eup %2903 }
0x1c97   :  { %v1499_v11 = vadd.f32 1.0, %v2904_v22  ;;  %2749 = vmatpush3.bf16.msra.mxu0 %v2748_v48 }
0x1c98   :  { %2762 = vmatprep.subr.bf16.mxu0 %v2970_v1 }
0x1c99   :  { %2905 = vrcp.f32 %v1499_v11 }
0x1ca3   :  { %v2906_v23 = vpop.eup %2905 }
0x1ca4   :  { %v1506_v27 = vmul.f32 %v2906_v23, %v1504_v20 }
0x1ca9   :  { %v1534_v53 = vpop.permute.xlu0 %1533 }
0x1d07   :  { %v1509_v24 = vpop.permute.xlu1 %1508 }
0x1d08   :  { %v1511_v25 = vmul.f32 %v2906_v23, %v1509_v24 }
0x1d0a   :  { %1513 = vrot.lane.b32.xlu1 %v1511_v25, %s2972_s14 }
0x1d7c   :  { %v1514_v15 = vpop.permute.xlu1 %1513 }
0x1d7d   :  { %v3232_v28 = vadd.f32 %v1514_v15, %v1506_v27 }
0x1d7f   :  { %2907 = vtanh.f32 %v3232_v28 }
0x1d89   :  { %v2908_v47 = vpop.eup %2907 }
0x1d8a   :  { %1519 = vrot.lane.b32.xlu1 %v2908_v47, %s2971_s11 }
0x1dfc   :  { %v1520_v50 = vpop.permute.xlu1 %1519 }
0x1dfd   :  { %v3258_v51 = vmul.f32 %v2906_v23, %v1520_v50 }
0x1dff   :  { %v1531_v32 = vsel %vm1527_vm5, %v3211_v14, %v3258_v51 }
0x1e00   :  { %1537 = vrot.lane.b32.xlu1 %v1531_v32, %s2971_s11 }
0x1e04   :  { %1705 = vrot.lane.b32.xlu1 %v2287_v52, %s2972_s14 }
0x1e72   :  { %v1538_v54 = vpop.permute.xlu1 %1537 }
0x1e73   :  { %v1540_v55 = vsel %vm163_vm2, %v1534_v53, %v1538_v54 }
0x1e74   :  { %2574 = vmatmul.mubr.msk.f32.vlgmr.msra.gmra.mrb[18].mxu0 %vm1545_vm6, %v1540_v55 }
0x1e75   :  { %2764 = vmatpush3.bf16.msra.mxu0 %v3235_v38  ;;  %2606 = vmatprep.mubr.msk.f32.mxu0 %vm2969_vm0, %v2968_v0 }
0x1e76   :  { %2765 = vmatprep.subr.bf16.mxu0 %v2970_v1  ;;  %v1706_v7 = vpop.permute.xlu1 %1705 }
0x1e79   :  { %2767 = vmatpush3.bf16.msra.mxu0 %v3239_v43 }
0x1e7a   :  { %2774 = vmatprep.subr.bf16.mxu0 %v2970_v1 }
0x1f47   :  { %v1615_v59 = vpop.f32.mrb[18].mxu0 }
0x1f48   :  { %v3279_v26 = vadd.f32 %v2284_v58, %v1615_v59  ;;  %v2575_v60 = vpop.f32.mrb[19].mxu0 }
0x1f4a   :  { %v1696_v61 = vadd.f32 %v1692_v56, %v3279_v26 }
0x1f4c   :  { %2909 = vtanh.f32 %v1696_v61  ;;  %v2289_v62 = vmul.f32 -1.442695, %v1696_v61 }
0x1f4e   :  { %2911 = vpow2.f32 %v2289_v62 }
0x1f56   :  { %v2910_v14 = vpop.eup %2909 }
0x1f57   :  { %1710 = vrot.lane.b32.xlu0 %v2910_v14, %s2971_s11 }
0x1f58   :  { %v2912_v63 = vpop.eup %2911 }
0x1f59   :  { %v1700_v2 = vadd.f32 1.0, %v2912_v63 }
0x1f5b   :  { %2913 = vrcp.f32 %v1700_v2 }
0x1f65   :  { %v2914_v3 = vpop.eup %2913 }
0x1f66   :  { %v1708_v9 = vmul.f32 %v2914_v3, %v1706_v7 }
0x1fc9   :  { %v1711_v4 = vpop.permute.xlu0 %1710 }
0x1fca   :  { %v1713_v5 = vmul.f32 %v2914_v3, %v1711_v4 }
0x1fcc   :  { %1715 = vrot.lane.b32.xlu0 %v1713_v5, %s2972_s14 }
0x203e   :  { %v1716_v10 = vpop.permute.xlu0 %1715 }
0x203f   :  { %v1718_v6 = vadd.f32 %v1716_v10, %v1708_v9 }
0x2041   :  { %2915 = vtanh.f32 %v1718_v6  ;;  %v1812_v29 = vrot.slane %v1718_v6, 6 }
0x204b   :  { %v2916_v13 = vpop.eup %2915 }
0x204c   :  { %1721 = vrot.lane.b32.xlu1 %v2916_v13, %s2971_s11 }
0x20be   :  { %v1722_v16 = vpop.permute.xlu1 %1721 }
0x20bf   :  { %v3285_v17 = vmul.f32 %v2914_v3, %v1722_v16 }
0x20c1   :  { %1726 = vrot.lane.b32.xlu0 %v3285_v17, %s2972_s14 }
0x2133   :  { %v1727_v18 = vpop.permute.xlu0 %1726 }
0x2134   :  { %2596 = vmatmul.mubr.msk.f32.vlgmr.msra.gmra.mrb[12].mxu1 %vm163_vm2, %v1727_v18 }
0x2135   :  { %2770 = vmatpush3.bf16.msra.mxu1 %v3235_v38  ;;  %2617 = vmatprep.mubr.msk.f32.mxu1 %vm2969_vm0, %v2968_v0 }
0x2136   :  { %2771 = vmatprep.subr.bf16.mxu1 %v2970_v1 }
0x2139   :  { %2773 = vmatpush3.bf16.msra.mxu1 %v3239_v43 }
0x213a   :  { %2780 = vmatprep.subr.bf16.mxu1 %v2970_v1 }
0x2207   :  { %v1796_v19 = vpop.f32.mrb[12].mxu1 }
0x2208   :  { %v1801_v21 = vrot.slane %v1796_v19, 6  ;;  %v2597_v22 = vpop.f32.mrb[13].mxu1 }
0x2209   :  { %v56_v22 = vld [vmem:[#allocation2 + $0xb0] sm:$0xff] }
0x220a   :  { %v1803_v11 = vadd.f32 %v1801_v21, %v3279_v26 }
0x220c   :  { %2917 = vtanh.f32 %v1803_v11  ;;  %v2291_v24 = vmul.f32 -1.442695, %v1803_v11  ;;  %v57_v11 = vld [vmem:[#allocation2 + $0xb8] sm:$0xff] }
0x220e   :  { %2919 = vpow2.f32 %v2291_v24  ;;  %v58_v24 = vld [vmem:[#allocation2 + $0xc0] sm:$0xff] }
0x2216   :  { %v2918_v23 = vpop.eup %2917 }
0x2217   :  { %1816 = vrot.lane.b32.xlu1 %v2918_v23, %s2971_s11  ;;  %v2775_v23 = vpack.c.bf16 %v57_v11, %v56_v22 }
0x2218   :  { %v2920_v25 = vpop.eup %2919 }
0x2219   :  { %v1807_v20 = vadd.f32 1.0, %v2920_v25  ;;  %v59_v25 = vld [vmem:[#allocation2 + $0xc8] sm:$0xff] }
0x221b   :  { %2921 = vrcp.f32 %v1807_v20  ;;  %v2778_v20 = vpack.c.bf16 %v59_v25, %v58_v24 }
0x2225   :  { %v2922_v27 = vpop.eup %2921 }
0x2226   :  { %v1814_v31 = vmul.f32 %v2922_v27, %v1812_v29  ;;  %v2052_v29 = vrot.slane %v3285_v17, 5 }
0x2289   :  { %v1817_v15 = vpop.permute.xlu1 %1816 }
0x228a   :  { %v1819_v30 = vmul.f32 %v2922_v27, %v1817_v15 }
0x228c   :  { %1821 = vrot.lane.b32.xlu0 %v1819_v30, %s2972_s14 }
0x22fe   :  { %v1822_v33 = vpop.permute.xlu0 %1821 }
0x22ff   :  { %v1824_v34 = vadd.f32 %v1822_v33, %v1814_v31 }
0x2301   :  { %2923 = vtanh.f32 %v1824_v34  ;;  %v1919_v32 = vrot.slane %v1824_v34, 6 }
0x230b   :  { %v2924_v35 = vpop.eup %2923 }
0x230c   :  { %1827 = vrot.lane.b32.xlu1 %v2924_v35, %s2971_s11  ;;  %v60_v35 = vld [vmem:[#allocation2 + $0xd0] sm:$0xff] }
0x237e   :  { %v1828_v36 = vpop.permute.xlu1 %1827 }
0x237f   :  { %v3300_v37 = vmul.f32 %v2922_v27, %v1828_v36  ;;  %v61_v36 = vld [vmem:[#allocation2 + $0xd8] sm:$0xff] }
0x2381   :  { %v1832_v38 = vrot.slane %v3300_v37, 2  ;;  %v2045_v56 = vrot.slane %v3300_v37, 1 }
0x2383   :  { %1833 = vrot.lane.b32.xlu0 %v1832_v38, %s2972_s14  ;;  %v2059_v61 = vsel %vm2058_vm7, %v3285_v17, %v2045_v56  ;;  %v62_v38 = vld [vmem:[#allocation2 + $0xe0] sm:$0xff]  ;;  %v64_v17 = vld [vmem:[#allocation2 + $0xf0] sm:$0xff] }
0x23f5   :  { %v1834_v39 = vpop.permute.xlu0 %1833 }
0x23f6   :  { %2607 = vmatmul.mubr.msk.f32.vlgmr.msra.gmra.mrb[20].mxu0 %vm163_vm2, %v1834_v39 }
0x23f7   :  { %2628 = vmatprep.mubr.msk.f32.mxu0 %vm2969_vm0, %v2968_v0  ;;  %2776 = vmatpush3.bf16.msra.mxu0 %v2775_v23 }
0x23f8   :  { %2777 = vmatprep.subr.bf16.mxu0 %v2970_v1 }
0x23fb   :  { %2779 = vmatpush3.bf16.msra.mxu0 %v2778_v20 }
0x24c9   :  { %v1903_v40 = vpop.f32.mrb[20].mxu0 }
0x24ca   :  { %v1908_v41 = vrot.slane %v1903_v40, 4  ;;  %v2608_v42 = vpop.f32.mrb[21].mxu0  ;;  %v2781_v40 = vpack.c.bf16 %v61_v36, %v60_v35 }
0x24cc   :  { %v1910_v43 = vadd.f32 %v1908_v41, %v3279_v26  ;;  %v63_v41 = vld [vmem:[#allocation2 + $0xe8] sm:$0xff] }
0x24ce   :  { %2925 = vtanh.f32 %v1910_v43  ;;  %v2293_v45 = vmul.f32 -1.442695, %v1910_v43 }
0x24d0   :  { %2927 = vpow2.f32 %v2293_v45 }
0x24d8   :  { %v2926_v44 = vpop.eup %2925 }
0x24d9   :  { %1923 = vrot.lane.b32.xlu1 %v2926_v44, %s2971_s11  ;;  %v2784_v44 = vpack.c.bf16 %v63_v41, %v62_v38 }
0x24da   :  { %v2928_v46 = vpop.eup %2927 }
0x24db   :  { %v1914_v47 = vadd.f32 1.0, %v2928_v46  ;;  %v66_v46 = vld [vmem:[#allocation2 + $0x100] sm:$0xff] }
0x24dd   :  { %2929 = vrcp.f32 %v1914_v47  ;;  %v67_v47 = vld [vmem:[#allocation2 + $0x108] sm:$0xff] }
0x24e7   :  { %v2930_v48 = vpop.eup %2929 }
0x24e8   :  { %v1921_v52 = vmul.f32 %v2930_v48, %v1919_v32 }
0x254b   :  { %v1924_v49 = vpop.permute.xlu1 %1923 }
0x254c   :  { %v1926_v50 = vmul.f32 %v2930_v48, %v1924_v49  ;;  %v68_v49 = vld [vmem:[#allocation2 + $0x110] sm:$0xff] }
0x254e   :  { %1928 = vrot.lane.b32.xlu0 %v1926_v50, %s2972_s14  ;;  %v69_v50 = vld [vmem:[#allocation2 + $0x118] sm:$0xff] }
0x254f   :  { %v2793_v32 = vpack.c.bf16 %v69_v50, %v68_v49 }
0x25c0   :  { %v1929_v53 = vpop.permute.xlu0 %1928 }
0x25c1   :  { %v1931_v54 = vadd.f32 %v1929_v53, %v1921_v52  ;;  %v70_v52 = vld [vmem:[#allocation2 + $0x120] sm:$0xff]  ;;  %v71_v53 = vld [vmem:[#allocation2 + $0x128] sm:$0xff] }
0x25c3   :  { %2931 = vtanh.f32 %v1931_v54 }
0x25cd   :  { %v2932_v55 = vpop.eup %2931 }
0x25ce   :  { %1934 = vrot.lane.b32.xlu1 %v2932_v55, %s2971_s11  ;;  %v73_v55 = vld [vmem:[#allocation2 + $0x138] sm:$0xff] }
0x2640   :  { %v1935_v57 = vpop.permute.xlu1 %1934 }
0x2641   :  { %v1937_v58 = vmul.f32 %v2930_v48, %v1935_v57  ;;  %v2790_v48 = vpack.c.bf16 %v67_v47, %v66_v46 }
0x2643   :  { %v2047_v59 = vrot.slane %v1937_v58, 2  ;;  %v1939_v60 = vrot.slane %v1937_v58, 4  ;;  %v2056_v33 = vrot.slane %v1937_v58, 7 }
0x2645   :  { %v2060_v14 = vsel %vm1523_vm3, %v2059_v61, %v2047_v59  ;;  %1940 = vrot.lane.b32.xlu0 %v1939_v60, %s2972_s14 }
0x26b7   :  { %v1941_v62 = vpop.permute.xlu0 %1940 }
0x26b8   :  { %2618 = vmatmul.mubr.msk.f32.vlgmr.msra.gmra.mrb[14].mxu1 %vm163_vm2, %v1941_v62 }
0x26b9   :  { %2663 = vmatprep.mubr.msk.f32.mxu1 %vm2969_vm0, %v2968_v0  ;;  %v2026_v0 = vrot.slane %v1931_v54, 6  ;;  %2782 = vmatpush3.bf16.msra.mxu1 %v2781_v40  ;;  %v72_v54 = vld [vmem:[#allocation2 + $0x130] sm:$0xff] }
0x26ba   :  { %2783 = vmatprep.subr.bf16.mxu1 %v2970_v1  ;;  %v2799_v56 = vpack.c.bf16 %v73_v55, %v72_v54 }
0x26bd   :  { %2785 = vmatpush3.bf16.msra.mxu1 %v2784_v44 }
0x26be   :  { %2786 = vmatprep.subr.bf16.mxu1 %v2970_v1 }
0x278b   :  { %v2010_v63 = vpop.f32.mrb[14].mxu1 }
0x278c   :  { %v2015_v2 = vrot.slane %v2010_v63, 2  ;;  %v2619_v3 = vpop.f32.mrb[15].mxu1 }
0x278d   :  { %v75_v3 = vld [vmem:[#allocation2 + $0x148] sm:$0xff] }
0x278e   :  { %v2017_v4 = vadd.f32 %v2015_v2, %v3279_v26  ;;  %v74_v2 = vld [vmem:[#allocation2 + $0x140] sm:$0xff] }
0x2790   :  { %2933 = vtanh.f32 %v2017_v4  ;;  %v2295_v7 = vmul.f32 -1.442695, %v2017_v4  ;;  %v2802_v4 = vpack.c.bf16 %v75_v3, %v74_v2 }
0x2792   :  { %2935 = vpow2.f32 %v2295_v7 }
0x279a   :  { %v2934_v5 = vpop.eup %2933 }
0x279b   :  { %2030 = vrot.lane.b32.xlu1 %v2934_v5, %s2971_s11  ;;  %v2296_v5 = vld [vmem:[%s3370_s4 + $0x3] ss:$0 sm:$0xff] }
0x279c   :  { %v2936_v9 = vpop.eup %2935 }
0x279d   :  { %v2021_v10 = vadd.f32 1.0, %v2936_v9 }
0x279f   :  { %2937 = vrcp.f32 %v2021_v10 }
0x27a9   :  { %v2938_v6 = vpop.eup %2937 }
0x27aa   :  { %v2028_v18 = vmul.f32 %v2938_v6, %v2026_v0 }
0x280d   :  { %v2031_v13 = vpop.permute.xlu1 %2030 }
0x280e   :  { %v2033_v16 = vmul.f32 %v2938_v6, %v2031_v13 }
0x2810   :  { %2035 = vrot.lane.b32.xlu0 %v2033_v16, %s2972_s14 }
0x2882   :  { %v2036_v19 = vpop.permute.xlu0 %2035 }
0x2883   :  { %v3321_v21 = vadd.f32 %v2036_v19, %v2028_v18 }
0x2885   :  { %2939 = vtanh.f32 %v3321_v21 }
0x288f   :  { %v2940_v26 = vpop.eup %2939 }
0x2890   :  { %2041 = vrot.lane.b32.xlu1 %v2940_v26, %s2971_s11 }
0x2894   :  { %2225 = vrot.lane.b32.xlu1 %v3223_v12, %s2972_s14  ;;  %v2054_v12 = vrot.slane %v3300_v37, 6  ;;  %v65_v37 = vld [vmem:[#allocation2 + $0xf8] sm:$0xff] }
0x2895   :  { %v2787_v45 = vpack.c.bf16 %v65_v37, %v64_v17 }
0x2897   :  { %2788 = vmatpush3.bf16.msra.mxu1 %v2787_v45 }
0x2898   :  { %2789 = vmatprep.subr.bf16.mxu1 %v2970_v1 }
0x289b   :  { %2791 = vmatpush3.bf16.msra.mxu1 %v2790_v48 }
0x289c   :  { %2792 = vmatprep.subr.bf16.mxu1 %v2970_v1 }
0x289f   :  { %2794 = vmatpush3.bf16.msra.mxu1 %v2793_v32 }
0x28a0   :  { %2795 = vmatprep.subr.bf16.mxu1 %v2970_v1 }
0x2902   :  { %v2042_v27 = vpop.permute.xlu1 %2041 }
0x2903   :  { %v2044_v15 = vmul.f32 %v2938_v6, %v2042_v27  ;;  %v2298_v6 = vld [vmem:[%s3370_s4 + $0x4] ss:$0 sm:$0xff] }
0x2905   :  { %v2050_v30 = vrot.slane %v2044_v15, 3  ;;  %2241 = vrot.lane.b32.xlu1 %v2044_v15, %s2972_s14 }
0x2907   :  { %v2062_v31 = vsel %vm2061_vm8, %v2060_v14, %v2050_v30 }
0x2908   :  { %v2063_v34 = vsel %vm1525_vm4, %v2062_v31, %v2052_v29 }
0x2909   :  { %v2065_v39 = vsel %vm2064_vm9, %v2063_v34, %v2054_v12 }
0x290a   :  { %v2066_v42 = vsel %vm1527_vm5, %v2065_v39, %v2056_v33 }
0x290b   :  { %v2068_v43 = vsel %vm2067_vm10, %v2066_v42, %v2044_v15 }
0x290c   :  { %2074 = vrot.lane.b32.xlu0 %v2068_v43, %s2972_s14 }
0x2910   :  { %2229 = vrot.lane.b32.xlu0 %v3258_v51, %s2973_s29  ;;  %v2796_v51 = vpack.c.bf16 %v71_v53, %v70_v52 }
0x2912   :  { %2797 = vmatpush3.bf16.msra.mxu1 %v2796_v51 }
0x2913   :  { %2798 = vmatprep.subr.bf16.mxu1 %v2970_v1 }
0x2914   :  { %2233 = vrot.lane.b32.xlu0 %v3232_v28, %s2971_s11  ;;  %v2226_v28 = vpop.permute.xlu1 %2225 }
0x2915   :  { %v2236_v14 = vsel %vm163_vm2, %v2226_v28, %v3219_v8 }
0x2916   :  { %2800 = vmatpush3.bf16.msra.mxu1 %v2799_v56 }
0x2917   :  { %2801 = vmatprep.subr.bf16.mxu1 %v2970_v1 }
0x291a   :  { %2803 = vmatpush3.bf16.msra.mxu1 %v2802_v4 }
0x2977   :  { %v2242_v57 = vpop.permute.xlu1 %2241 }
0x2978   :  { %v2244_v58 = vsel %vm163_vm2, %v2242_v57, %v3321_v21 }
0x2979   :  { %v2245_v59 = vsel %vm1545_vm6, %v2244_v58, 0.0 }
0x297a   :  { %2246 = vst [vmem:[%s3371_s5 + $0x4] sm:$0xc0] %v2245_v59 }
0x297e   :  { %v2075_v60 = vpop.permute.xlu0 %2074 }
0x297f   :  { %2629 = vmatmul.mubr.msk.f32.vlgmr.msra.gmra.mrb[22].mxu0 %vm163_vm2, %v2075_v60 }
0x2982   :  { %v2230_v61 = vpop.permute.xlu0 %2229 }
0x2983   :  { %v2237_v1 = vsel %vm1545_vm6, %v2236_v14, %v2230_v61 }
0x2986   :  { %v2234_v62 = vpop.permute.xlu0 %2233 }
0x2987   :  { %v2239_v63 = vsel %vm2238_vm11, %v2237_v1, %v2234_v62 }
0x2988   :  { %2240 = vst [vmem:[%s3371_s5 + $0x2] sm:$0xc0] %v2239_v63 }
0x2a52   :  { %v2144_v7 = vpop.f32.mrb[22].mxu0 }
0x2a53   :  { %v2145_v9 = vadd.f32 %v2296_v5, %v2144_v7  ;;  %v2630_v10 = vpop.f32.mrb[23].mxu0 }
0x2a55   :  { %v2148_v8 = vmax.f32 %v2145_v9, 0.0 }
0x2a57   :  { %2664 = vmatmul.mubr.f32.vlgmr.msra.gmra.mrb[16].mxu1 %v2148_v8 }
0x2b2a   :  { %v2219_v13 = vpop.f32.mrb[16].mxu1 }
0x2b2b   :  { %v2220_v16 = vadd.f32 %v2298_v6, %v2219_v13  ;;  %v2665_v0 = vpop.f32.mrb[17].mxu1 }
0x2b2d   :  { %2223 = vst [vmem:[%s3371_s5] sm:$0xff] %v2220_v16 }
0x2b2e   :  { %2251 = vsyncpa [#allocation3], 1 }

</bundles_post_ra>
